<compile_context>
chip_gen: v7x
topology: tpu7x:2x2x1
jax: 0.10.0
libtpu: 0.0.40
codegen_flags: <defaults>
</compile_context>

<pallas_src>
import functools
import math

import jax
import jax.numpy as jnp
from jax import lax
from jax.experimental import pallas as pl
from jax.experimental.pallas import tpu as pltpu


# --------------------------------------------------------------------------- helpers

def _vmem_limit_bytes():
    """Chip-aware scoped-VMEM budget (leave headroom below physical capacity)."""
    try:
        cap = pltpu.get_tpu_info().vmem_capacity_bytes
    except Exception:
        cap = 128 * 1024 * 1024
    return int(min(cap * 3 // 4, 96 * 1024 * 1024))


def _pick_tile(n, target, multiple=8):
    """Largest divisor of n that is <= target (prefer multiples of `multiple`).

    Never falls back to the full n when n > target (the previous version did,
    which was a latent VMEM blow-up for large, hard-to-factor n).
    """
    if n <= target:
        return n
    t = target - (target % multiple)
    while t >= multiple:
        if n % t == 0:
            return t
        t -= multiple
    for t in range(min(target, n), 0, -1):
        if n % t == 0:
            return t
    return 1


# --------------------------------------------------------------------------- kernels

def _mha_flash_kernel(q_ref, k_ref, vk_ref, vq_ref,
                      wq_ref, bq_ref, wk_ref, bk_ref, wv_ref, bv_ref,
                      wo_ref, bo_ref, g_ref, b_ref,
                      o_ref,
                      qh_sc, kh_sc, vh_sc, m_sc, l_sc, acc_sc,
                      *, n_heads, eps):
    """Flash-style fused QKV-proj + MHA + out-proj + (+V residual) + LayerNorm.

    Grid = (batch, query tiles, kv tiles); kv tiles are the reduction ("arbitrary") axis.
    """
    f32 = jnp.float32
    bf16 = jnp.bfloat16
    ki = pl.program_id(2)
    nk = pl.num_programs(2)

    tq, kdim = q_ref.shape[1], q_ref.shape[2]
    vdim = vk_ref.shape[2]
    dk = kdim // n_heads
    dv = vdim // n_heads

    @pl.when(ki == 0)
    def _init():
        # Q projection once per (batch, query tile): one full-width bf16 GEMM,
        # staged head-major into VMEM scratch (no lane concatenate later).
        xq = q_ref[0].astype(bf16)
        q = jnp.dot(xq, wq_ref[...], preferred_element_type=f32) + bq_ref[...]
        q = q.astype(bf16)
        for h in range(n_heads):
            qh_sc[h] = q[:, h * dk:(h + 1) * dk]
        m_sc[...] = jnp.full(m_sc.shape, -jnp.inf, dtype=f32)
        l_sc[...] = jnp.zeros(l_sc.shape, dtype=f32)
        acc_sc[...] = jnp.zeros(acc_sc.shape, dtype=f32)

    # K / V projections for this KV tile: full-width bf16 GEMMs, staged head-major.
    # TODO(synk): for very large S, hoist the K/V projections into a separate GEMM pass
    #             (they are recomputed once per query tile here).
    xk = k_ref[0].astype(bf16)
    xv = vk_ref[0].astype(bf16)
    k = (jnp.dot(xk, wk_ref[...], preferred_element_type=f32) + bk_ref[...]).astype(bf16)
    v = (jnp.dot(xv, wv_ref[...], preferred_element_type=f32) + bv_ref[...]).astype(bf16)
    for h in range(n_heads):
        kh_sc[h] = k[:, h * dk:(h + 1) * dk]
        vh_sc[h] = v[:, h * dv:(h + 1) * dv]

    # Head-batched flash attention step (1/sqrt(dk) is pre-folded into wq/bq).
    s = jnp.einsum("hqd,hkd->hqk", qh_sc[...], kh_sc[...],
                   preferred_element_type=f32)                       # (H, tq, tk)
    m_prev = m_sc[...]
    m_new = jnp.maximum(m_prev, s.max(axis=-1, keepdims=True))
    alpha = jnp.exp(m_prev - m_new)
    p = jnp.exp(s - m_new)
    l_sc[...] = alpha * l_sc[...] + p.sum(axis=-1, keepdims=True)
    acc_sc[...] = alpha * acc_sc[...] + jnp.einsum(
        "hqk,hkd->hqd", p.astype(bf16), vh_sc[...], preferred_element_type=f32)
    m_sc[...] = m_new

    @pl.when(ki == nk - 1)
    def _finalize():
        # Exact normalization (approx reciprocal was the accuracy bottleneck; the
        # divide sits in the epilogue and its EUP cost is hidden anyway).
        attn = (acc_sc[...] / l_sc[...]).astype(bf16)                # (H, tq, dv)
        # Output projection straight from the head-major accumulator:
        #   out = sum_h attn[h] @ Wo[h*dv:(h+1)*dv, :]   (Wo reshaped head-major on host)
        out = jnp.dot(attn[0], wo_ref[0], preferred_element_type=f32)
        for h in range(1, n_heads):
            out = out + jnp.dot(attn[h], wo_ref[h], preferred_element_type=f32)
        sub = out + bo_ref[...]
        # skip_c_0: x = attn_out + V ; LayerNorm(x)
        x = sub + vq_ref[0].astype(f32)
        mu = jnp.mean(x, axis=-1, keepdims=True)
        var = jnp.mean((x - mu) ** 2, axis=-1, keepdims=True)
        xn = (x - mu) * lax.rsqrt(var + eps)
        o_ref[0] = (xn * g_ref[...] + b_ref[...]).astype(o_ref.dtype)


def _ffn_ln_kernel(x_ref, w1_ref, b1_ref, w2_ref, b2_ref, g_ref, b_ref,
                   o_ref, acc_ref, *, eps):
    """Fused Linear -> ReLU -> Linear -> (+x) -> LayerNorm, tiled over the hidden dim."""
    f32 = jnp.float32
    bf16 = jnp.bfloat16
    c = pl.program_id(1)
    nc = pl.num_programs(1)

    @pl.when(c == 0)
    def _init():
        acc_ref[...] = jnp.zeros(acc_ref.shape, dtype=f32)

    # One hidden-dim chunk:  acc += relu(x @ w1[:, chunk] + b1[chunk]) @ w2[chunk, :]
    x = x_ref[...].astype(bf16)
    h = jnp.dot(x, w1_ref[...], preferred_element_type=f32) + b1_ref[...]
    h = jnp.maximum(h, 0.0).astype(bf16)
    acc_ref[...] += jnp.dot(h, w2_ref[...], preferred_element_type=f32)

    @pl.when(c == nc - 1)
    def _finalize():
        # skip_c_1: y = ffn_out + x ; LayerNorm(y)
        y = acc_ref[...] + b2_ref[...] + x_ref[...].astype(f32)
        mu = jnp.mean(y, axis=-1, keepdims=True)
        var = jnp.mean((y - mu) ** 2, axis=-1, keepdims=True)
        yn = (y - mu) * lax.rsqrt(var + eps)
        o_ref[...] = (yn * g_ref[...] + b_ref[...]).astype(o_ref.dtype)


# --------------------------------------------------------------------------- wrappers

def fused_mha_addln(params, Q, K, V, n_heads, eps=1e-5):
    """x0 = LayerNorm(out_proj(MHA(Q, K, V)) + V), shape (B, S, vdim)."""
    B, S, kdim = Q.shape
    vdim = V.shape[-1]
    assert kdim % n_heads == 0 and vdim % n_heads == 0, "head dims must divide kdim/vdim"
    dk, dv = kdim // n_heads, vdim // n_heads
    scale = 1.0 / math.sqrt(dk)

    tq = _pick_tile(S, 256)
    tk = _pick_tile(S, 512)
    nq, nk = S // tq, S // tk

    f32, bf16 = jnp.float32, jnp.bfloat16
    # bf16 weights for the MXU; 1/sqrt(dk) folded into wq/bq; Wo reshaped head-major.
    wq = (params["wq"] * scale).astype(bf16)
    wk = params["wk"].astype(bf16)
    wv = params["wv"].astype(bf16)
    wo = params["wo"].reshape(n_heads, dv, vdim).astype(bf16)
    bq = (params["bq"] * scale).astype(f32).reshape(1, kdim)
    bk = params["bk"].astype(f32).reshape(1, kdim)
    bv = params["bv"].astype(f32).reshape(1, vdim)
    bo = params["bo"].astype(f32).reshape(1, vdim)
    g0 = params["ln0_g"].astype(f32).reshape(1, vdim)
    b0 = params["ln0_b"].astype(f32).reshape(1, vdim)

    kern = functools.partial(_mha_flash_kernel, n_heads=n_heads, eps=eps)

    q_map = lambda b, qi, ki: (b, qi, 0)
    kv_map = lambda b, qi, ki: (b, ki, 0)
    c2 = lambda b, qi, ki: (0, 0)
    c3 = lambda b, qi, ki: (0, 0, 0)

    # TODO(synk): on v7x, pipeline_mode=pl.Buffered(1) on the constant weight/bias specs
    #             would halve their VMEM footprint (single-buffer constants).
    in_specs = [
        pl.BlockSpec((1, tq, kdim), q_map),      # Q tile
        pl.BlockSpec((1, tk, kdim), kv_map),     # K tile
        pl.BlockSpec((1, tk, vdim), kv_map),     # V tile (keys/values side)
        pl.BlockSpec((1, tq, vdim), q_map),      # V tile (residual, query rows)
        pl.BlockSpec((kdim, kdim), c2),          # wq (pre-scaled, bf16)
        pl.BlockSpec((1, kdim), c2),             # bq
        pl.BlockSpec((kdim, kdim), c2),          # wk
        pl.BlockSpec((1, kdim), c2),             # bk
        pl.BlockSpec((vdim, vdim), c2),          # wv
        pl.BlockSpec((1, vdim), c2),             # bv
        pl.BlockSpec((n_heads, dv, vdim), c3),   # wo (head-major)
        pl.BlockSpec((1, vdim), c2),             # bo
        pl.BlockSpec((1, vdim), c2),             # ln0 gamma
        pl.BlockSpec((1, vdim), c2),             # ln0 beta
    ]

    return pl.pallas_call(
        kern,
        out_shape=jax.ShapeDtypeStruct((B, S, vdim), V.dtype),
        grid=(B, nq, nk),
        in_specs=in_specs,
        out_specs=pl.BlockSpec((1, tq, vdim), q_map),
        scratch_shapes=[
            pltpu.VMEM((n_heads, tq, dk), bf16),   # head-major Q (per query tile)
            pltpu.VMEM((n_heads, tk, dk), bf16),   # head-major K (per kv tile)
            pltpu.VMEM((n_heads, tk, dv), bf16),   # head-major V (per kv tile)
            pltpu.VMEM((n_heads, tq, 1), f32),     # online-softmax running max
            pltpu.VMEM((n_heads, tq, 1), f32),     # online-softmax running denom
            pltpu.VMEM((n_heads, tq, dv), f32),    # online-softmax running numerator
        ],
        compiler_params=pltpu.CompilerParams(
            dimension_semantics=("parallel", "parallel", "arbitrary"),
            vmem_limit_bytes=_vmem_limit_bytes()),
    )(Q, K, V, V, wq, bq, wk, bk, wv, bv, wo, bo, g0, b0)


def fused_ffn_addln(params, x, eps=1e-5):
    """x1 = LayerNorm(FFN(x) + x), x: (M, vdim)."""
    M, D = x.shape
    F = params["w1"].shape[1]

    vmem = _vmem_limit_bytes()
    tm = _pick_tile(M, 1024 if vmem >= 64 * 1024 * 1024 else 512)
    tf = _pick_tile(F, 2048, multiple=128)

    f32, bf16 = jnp.float32, jnp.bfloat16
    w1 = params["w1"].astype(bf16)
    w2 = params["w2"].astype(bf16)
    b1 = params["b1"].astype(f32).reshape(1, F)
    b2 = params["b2"].astype(f32).reshape(1, D)
    g1 = params["ln1_g"].astype(f32).reshape(1, D)
    bt1 = params["ln1_b"].astype(f32).reshape(1, D)

    kern = functools.partial(_ffn_ln_kernel, eps=eps)
    row_map = lambda i, c: (i, 0)
    w1_map = lambda i, c: (0, c)
    b1_map = lambda i, c: (0, c)
    w2_map = lambda i, c: (c, 0)
    c2 = lambda i, c: (0, 0)

    return pl.pallas_call(
        kern,
        out_shape=jax.ShapeDtypeStruct((M, D), x.dtype),
        grid=(M // tm, F // tf),
        in_specs=[
            pl.BlockSpec((tm, D), row_map),     # x (and residual), resident across chunks
            pl.BlockSpec((D, tf), w1_map),      # w1 hidden-chunk (bf16)
            pl.BlockSpec((1, tf), b1_map),      # b1 hidden-chunk
            pl.BlockSpec((tf, D), w2_map),      # w2 hidden-chunk (bf16)
            pl.BlockSpec((1, D), c2),           # b2
            pl.BlockSpec((1, D), c2),           # ln1 gamma
            pl.BlockSpec((1, D), c2),           # ln1 beta
        ],
        out_specs=pl.BlockSpec((tm, D), row_map),
        scratch_shapes=[pltpu.VMEM((tm, D), f32)],
        compiler_params=pltpu.CompilerParams(
            dimension_semantics=("parallel", "arbitrary"),
            vmem_limit_bytes=vmem),
    )(x, w1, b1, w2, b2, g1, bt1)


# --------------------------------------------------------------------------- layer

def init_params(key, kdim, vdim, n_heads, forward_expansion):
    ks = jax.random.split(key, 6)

    def lin(k, fan_in, fan_out):
        kw, kb = jax.random.split(k)
        bound = 1.0 / math.sqrt(fan_in)
        w = jax.random.uniform(kw, (fan_in, fan_out), jnp.float32, -bound, bound)
        b = jax.random.uniform(kb, (fan_out,), jnp.float32, -bound, bound)
        return w, b

    hidden = forward_expansion * vdim
    p = {}
    p["wq"], p["bq"] = lin(ks[0], kdim, kdim)
    p["wk"], p["bk"] = lin(ks[1], kdim, kdim)
    p["wv"], p["bv"] = lin(ks[2], vdim, vdim)
    p["wo"], p["bo"] = lin(ks[3], vdim, vdim)
    p["ln0_g"], p["ln0_b"] = jnp.ones((vdim,), jnp.float32), jnp.zeros((vdim,), jnp.float32)
    p["w1"], p["b1"] = lin(ks[4], vdim, hidden)
    p["w2"], p["b2"] = lin(ks[5], hidden, vdim)
    p["ln1_g"], p["ln1_b"] = jnp.ones((vdim,), jnp.float32), jnp.zeros((vdim,), jnp.float32)
    return p


def transformer_encoder_layer(params, Q, K, V, n_heads, attn_mask=None):
    # TODO(synk): attn_mask (additive mask on the score tile inside the flash loop)
    #             not wired in; padded-sequence use needs it.
    assert attn_mask is None, "attn_mask not supported in this kernel"
    B, S, _ = Q.shape
    vdim = V.shape[-1]

    x0 = fused_mha_addln(params, Q, K, V, n_heads)            # (B, S, vdim)
    # TODO(synk): when the combined weight set fits VMEM, fuse the FFN into the MHA
    #             epilogue to avoid the x0 HBM round trip.
    x1 = fused_ffn_addln(params, x0.reshape(B * S, vdim))     # (B*S, vdim)
    return x1.reshape(B, S, vdim)


# --------------------------------------------------------------------------- reference

def _reference(params, Q, K, V, n_heads):
    B, S, kdim = Q.shape
    vdim = V.shape[-1]
    dk, dv = kdim // n_heads, vdim // n_heads

    def lin(x, w, b):
        return x @ w + b

    q = lin(Q, params["wq"], params["bq"]).reshape(B, S, n_heads, dk).transpose(0, 2, 1, 3)
    k = lin(K, params["wk"], params["bk"]).reshape(B, S, n_heads, dk).transpose(0, 2, 1, 3)
    v = lin(V, params["wv"], params["bv"]).reshape(B, S, n_heads, dv).transpose(0, 2, 1, 3)
    s = jnp.einsum("bhqd,bhkd->bhqk", q, k) / math.sqrt(dk)
    p = jax.nn.softmax(s, axis=-1)
    o = jnp.einsum("bhqk,bhkd->bhqd", p, v).transpose(0, 2, 1, 3).reshape(B, S, vdim)
    sub = lin(o, params["wo"], params["bo"])

    def ln(x, g, b):
        mu = x.mean(-1, keepdims=True)
        var = ((x - mu) ** 2).mean(-1, keepdims=True)
        return (x - mu) * lax.rsqrt(var + 1e-5) * g + b

    x0 = ln(sub + V, params["ln0_g"], params["ln0_b"])
    h = jnp.maximum(lin(x0, params["w1"], params["b1"]), 0.0)
    f = lin(h, params["w2"], params["b2"])
    return ln(f + x0, params["ln1_g"], params["ln1_b"])


# --------------------------------------------------------------------------- main

if __name__ == "__main__":
    B, S, n_heads = 2, 8, 4
    kdim, vdim, forward_expansion = 32, 32, 2

    key = jax.random.PRNGKey(0)
    kp, kq, kk, kv = jax.random.split(key, 4)
    params = init_params(kp, kdim, vdim, n_heads, forward_expansion)

    Q = jax.random.normal(kq, (B, S, kdim), jnp.float32)
    K = jax.random.normal(kk, (B, S, kdim), jnp.float32)
    V = jax.random.normal(kv, (B, S, vdim), jnp.float32)

    out = transformer_encoder_layer(params, Q, K, V, n_heads)
    out = jax.block_until_ready(out)

    ref = _reference(params, Q, K, V, n_heads)
    assert out.shape == (B, S, vdim)
    # tolerance accounts for bf16 MXU inputs (accumulation stays f32, exact softmax divide)
    assert jnp.allclose(out, ref, atol=5e-2, rtol=5e-2), "mismatch vs JAX reference"

    print("KERNEL_OK")
</pallas_src>

<mosaic_0001>
module attributes {stable_mosaic.version = 11 : i64} {
  func.func @_mha_flash_kernel(%arg0: i32, %arg1: i32, %arg2: i32, %arg3: memref<1x8x32xf32, #tpu.memory_space<vmem>>, %arg4: memref<1x8x32xf32, #tpu.memory_space<vmem>>, %arg5: memref<1x8x32xf32, #tpu.memory_space<vmem>>, %arg6: memref<1x8x32xf32, #tpu.memory_space<vmem>>, %arg7: memref<32x32xbf16, #tpu.memory_space<vmem>>, %arg8: memref<1x32xf32, #tpu.memory_space<vmem>>, %arg9: memref<32x32xbf16, #tpu.memory_space<vmem>>, %arg10: memref<1x32xf32, #tpu.memory_space<vmem>>, %arg11: memref<32x32xbf16, #tpu.memory_space<vmem>>, %arg12: memref<1x32xf32, #tpu.memory_space<vmem>>, %arg13: memref<4x8x32xbf16, #tpu.memory_space<vmem>>, %arg14: memref<1x32xf32, #tpu.memory_space<vmem>>, %arg15: memref<1x32xf32, #tpu.memory_space<vmem>>, %arg16: memref<1x32xf32, #tpu.memory_space<vmem>>, %arg17: memref<1x8x32xf32, #tpu.memory_space<vmem>>, %arg18: memref<4x8x8xbf16, #tpu.memory_space<vmem>>, %arg19: memref<4x8x8xbf16, #tpu.memory_space<vmem>>, %arg20: memref<4x8x8xbf16, #tpu.memory_space<vmem>>, %arg21: memref<4x8x1xf32, #tpu.memory_space<vmem>>, %arg22: memref<4x8x1xf32, #tpu.memory_space<vmem>>, %arg23: memref<4x8x8xf32, #tpu.memory_space<vmem>>) attributes {dimension_semantics = [#tpu.dimension_semantics<parallel>, #tpu.dimension_semantics<parallel>, #tpu.dimension_semantics<arbitrary>], iteration_bounds = array<i64: 2, 1, 1>, scalar_prefetch = 0 : i64, scratch_operands = 6 : i64, tpu.core_type = #tpu.core_type<tc>, window_params = [{transform_indices = @transform_0, window_bounds = array<i64: 1, 8, 32>}, {transform_indices = @transform_1, window_bounds = array<i64: 1, 8, 32>}, {transform_indices = @transform_2, window_bounds = array<i64: 1, 8, 32>}, {transform_indices = @transform_3, window_bounds = array<i64: 1, 8, 32>}, {pipeline_mode = #tpu.pipeline_mode<synchronous>, transform_indices = @transform_4, window_bounds = array<i64: 32, 32>}, {pipeline_mode = #tpu.pipeline_mode<synchronous>, transform_indices = @transform_5, window_bounds = array<i64: 1, 32>}, {pipeline_mode = #tpu.pipeline_mode<synchronous>, transform_indices = @transform_6, window_bounds = array<i64: 32, 32>}, {pipeline_mode = #tpu.pipeline_mode<synchronous>, transform_indices = @transform_7, window_bounds = array<i64: 1, 32>}, {pipeline_mode = #tpu.pipeline_mode<synchronous>, transform_indices = @transform_8, window_bounds = array<i64: 32, 32>}, {pipeline_mode = #tpu.pipeline_mode<synchronous>, transform_indices = @transform_9, window_bounds = array<i64: 1, 32>}, {pipeline_mode = #tpu.pipeline_mode<synchronous>, transform_indices = @transform_10, window_bounds = array<i64: 4, 8, 32>}, {pipeline_mode = #tpu.pipeline_mode<synchronous>, transform_indices = @transform_11, window_bounds = array<i64: 1, 32>}, {pipeline_mode = #tpu.pipeline_mode<synchronous>, transform_indices = @transform_12, window_bounds = array<i64: 1, 32>}, {pipeline_mode = #tpu.pipeline_mode<synchronous>, transform_indices = @transform_13, window_bounds = array<i64: 1, 32>}, {transform_indices = @transform_14, window_bounds = array<i64: 1, 8, 32>}]} {
    %c0_i32 = arith.constant 0 : i32
    %0 = arith.cmpi eq, %arg2, %c0_i32 : i32
    %1 = arith.extui %0 : i1 to i32
    %c0_i32_0 = arith.constant 0 : i32
    %2 = arith.cmpi ne, %1, %c0_i32_0 : i32
    scf.if %2 {
      %c0_69 = arith.constant 0 : index
      %c0_70 = arith.constant 0 : index
      %c0_71 = arith.constant 0 : index
      %83 = vector.load %arg3[%c0_69, %c0_70, %c0_71] : memref<1x8x32xf32, #tpu.memory_space<vmem>>, vector<1x8x32xf32>
      %84 = vector.shape_cast %83 : vector<1x8x32xf32> to vector<8x32xf32>
      %85 = arith.truncf %84 : vector<8x32xf32> to vector<8x32xbf16>
      %c0_72 = arith.constant 0 : index
      %c0_73 = arith.constant 0 : index
      %86 = vector.load %arg7[%c0_72, %c0_73] : memref<32x32xbf16, #tpu.memory_space<vmem>>, vector<32x32xbf16>
      %cst_74 = arith.constant dense<0.000000e+00> : vector<8x32xf32>
      %87 = tpu.matmul %85, %86, %cst_74 {dimension_numbers = #tpu.dot_dimension_numbers<[1], [0], [0], [1], [0, 0, 1, 1], [], []>} : vector<8x32xbf16>, vector<32x32xbf16>, vector<8x32xf32> -> vector<8x32xf32>
      %c0_75 = arith.constant 0 : index
      %c0_76 = arith.constant 0 : index
      %88 = vector.load %arg8[%c0_75, %c0_76] : memref<1x32xf32, #tpu.memory_space<vmem>>, vector<1x32xf32>
      %89 = vector.broadcast %88 : vector<1x32xf32> to vector<8x32xf32>
      %90 = arith.addf %87, %89 : vector<8x32xf32>
      %91 = arith.truncf %90 : vector<8x32xf32> to vector<8x32xbf16>
      %92 = vector.extract_strided_slice %91 {offsets = [0, 0], sizes = [8, 8], strides = [1, 1]} : vector<8x32xbf16> to vector<8x8xbf16>
      %c0_77 = arith.constant 0 : index
      %c0_78 = arith.constant 0 : index
      %c0_79 = arith.constant 0 : index
      %93 = vector.load %arg18[%c0_77, %c0_78, %c0_79] : memref<4x8x8xbf16, #tpu.memory_space<vmem>>, vector<1x8x8xbf16>
      %94 = vector.shape_cast %93 : vector<1x8x8xbf16> to vector<8x8xbf16>
      %95 = vector.shape_cast %92 : vector<8x8xbf16> to vector<1x8x8xbf16>
      tpu.vector_store %arg18[%c0_77, %c0_78, %c0_79], %95 {strides = array<i32>} : memref<4x8x8xbf16, #tpu.memory_space<vmem>>, vector<1x8x8xbf16>,
      %96 = vector.extract_strided_slice %91 {offsets = [0, 8], sizes = [8, 8], strides = [1, 1]} : vector<8x32xbf16> to vector<8x8xbf16>
      %c1_80 = arith.constant 1 : index
      %c0_81 = arith.constant 0 : index
      %c0_82 = arith.constant 0 : index
      %97 = vector.load %arg18[%c1_80, %c0_81, %c0_82] : memref<4x8x8xbf16, #tpu.memory_space<vmem>>, vector<1x8x8xbf16>
      %98 = vector.shape_cast %97 : vector<1x8x8xbf16> to vector<8x8xbf16>
      %99 = vector.shape_cast %96 : vector<8x8xbf16> to vector<1x8x8xbf16>
      tpu.vector_store %arg18[%c1_80, %c0_81, %c0_82], %99 {strides = array<i32>} : memref<4x8x8xbf16, #tpu.memory_space<vmem>>, vector<1x8x8xbf16>,
      %100 = vector.extract_strided_slice %91 {offsets = [0, 16], sizes = [8, 8], strides = [1, 1]} : vector<8x32xbf16> to vector<8x8xbf16>
      %c2_83 = arith.constant 2 : index
      %c0_84 = arith.constant 0 : index
      %c0_85 = arith.constant 0 : index
      %101 = vector.load %arg18[%c2_83, %c0_84, %c0_85] : memref<4x8x8xbf16, #tpu.memory_space<vmem>>, vector<1x8x8xbf16>
      %102 = vector.shape_cast %101 : vector<1x8x8xbf16> to vector<8x8xbf16>
      %103 = vector.shape_cast %100 : vector<8x8xbf16> to vector<1x8x8xbf16>
      tpu.vector_store %arg18[%c2_83, %c0_84, %c0_85], %103 {strides = array<i32>} : memref<4x8x8xbf16, #tpu.memory_space<vmem>>, vector<1x8x8xbf16>,
      %104 = vector.extract_strided_slice %91 {offsets = [0, 24], sizes = [8, 8], strides = [1, 1]} : vector<8x32xbf16> to vector<8x8xbf16>
      %c3_86 = arith.constant 3 : index
      %c0_87 = arith.constant 0 : index
      %c0_88 = arith.constant 0 : index
      %105 = vector.load %arg18[%c3_86, %c0_87, %c0_88] : memref<4x8x8xbf16, #tpu.memory_space<vmem>>, vector<1x8x8xbf16>
      %106 = vector.shape_cast %105 : vector<1x8x8xbf16> to vector<8x8xbf16>
      %107 = vector.shape_cast %104 : vector<8x8xbf16> to vector<1x8x8xbf16>
      tpu.vector_store %arg18[%c3_86, %c0_87, %c0_88], %107 {strides = array<i32>} : memref<4x8x8xbf16, #tpu.memory_space<vmem>>, vector<1x8x8xbf16>,
      %cst_89 = arith.constant 0xFF800000 : f32
      %108 = vector.broadcast %cst_89 : f32 to vector<4x8x1xf32>
      %c0_90 = arith.constant 0 : index
      %c0_91 = arith.constant 0 : index
      %c0_92 = arith.constant 0 : index
      %109 = vector.load %arg21[%c0_90, %c0_91, %c0_92] : memref<4x8x1xf32, #tpu.memory_space<vmem>>, vector<4x8x1xf32>
      tpu.vector_store %arg21[%c0_90, %c0_91, %c0_92], %108 {strides = array<i32>} : memref<4x8x1xf32, #tpu.memory_space<vmem>>, vector<4x8x1xf32>,
      %cst_93 = arith.constant 0.000000e+00 : f32
      %110 = vector.broadcast %cst_93 : f32 to vector<4x8x1xf32>
      %c0_94 = arith.constant 0 : index
      %c0_95 = arith.constant 0 : index
      %c0_96 = arith.constant 0 : index
      %111 = vector.load %arg22[%c0_94, %c0_95, %c0_96] : memref<4x8x1xf32, #tpu.memory_space<vmem>>, vector<4x8x1xf32>
      tpu.vector_store %arg22[%c0_94, %c0_95, %c0_96], %110 {strides = array<i32>} : memref<4x8x1xf32, #tpu.memory_space<vmem>>, vector<4x8x1xf32>,
      %cst_97 = arith.constant 0.000000e+00 : f32
      %112 = vector.broadcast %cst_97 : f32 to vector<4x8x8xf32>
      %c0_98 = arith.constant 0 : index
      %c0_99 = arith.constant 0 : index
      %c0_100 = arith.constant 0 : index
      %113 = vector.load %arg23[%c0_98, %c0_99, %c0_100] : memref<4x8x8xf32, #tpu.memory_space<vmem>>, vector<4x8x8xf32>
      tpu.vector_store %arg23[%c0_98, %c0_99, %c0_100], %112 {strides = array<i32>} : memref<4x8x8xf32, #tpu.memory_space<vmem>>, vector<4x8x8xf32>,
    } else {
    }
    %c0 = arith.constant 0 : index
    %c0_1 = arith.constant 0 : index
    %c0_2 = arith.constant 0 : index
    %3 = vector.load %arg4[%c0, %c0_1, %c0_2] : memref<1x8x32xf32, #tpu.memory_space<vmem>>, vector<1x8x32xf32>
    %4 = vector.shape_cast %3 : vector<1x8x32xf32> to vector<8x32xf32>
    %5 = arith.truncf %4 : vector<8x32xf32> to vector<8x32xbf16>
    %c0_3 = arith.constant 0 : index
    %c0_4 = arith.constant 0 : index
    %c0_5 = arith.constant 0 : index
    %6 = vector.load %arg5[%c0_3, %c0_4, %c0_5] : memref<1x8x32xf32, #tpu.memory_space<vmem>>, vector<1x8x32xf32>
    %7 = vector.shape_cast %6 : vector<1x8x32xf32> to vector<8x32xf32>
    %8 = arith.truncf %7 : vector<8x32xf32> to vector<8x32xbf16>
    %c0_6 = arith.constant 0 : index
    %c0_7 = arith.constant 0 : index
    %9 = vector.load %arg9[%c0_6, %c0_7] : memref<32x32xbf16, #tpu.memory_space<vmem>>, vector<32x32xbf16>
    %cst = arith.constant dense<0.000000e+00> : vector<8x32xf32>
    %10 = tpu.matmul %5, %9, %cst {dimension_numbers = #tpu.dot_dimension_numbers<[1], [0], [0], [1], [0, 0, 1, 1], [], []>} : vector<8x32xbf16>, vector<32x32xbf16>, vector<8x32xf32> -> vector<8x32xf32>
    %c0_8 = arith.constant 0 : index
    %c0_9 = arith.constant 0 : index
    %11 = vector.load %arg10[%c0_8, %c0_9] : memref<1x32xf32, #tpu.memory_space<vmem>>, vector<1x32xf32>
    %12 = vector.broadcast %11 : vector<1x32xf32> to vector<8x32xf32>
    %13 = arith.addf %10, %12 : vector<8x32xf32>
    %14 = arith.truncf %13 : vector<8x32xf32> to vector<8x32xbf16>
    %c0_10 = arith.constant 0 : index
    %c0_11 = arith.constant 0 : index
    %15 = vector.load %arg11[%c0_10, %c0_11] : memref<32x32xbf16, #tpu.memory_space<vmem>>, vector<32x32xbf16>
    %cst_12 = arith.constant dense<0.000000e+00> : vector<8x32xf32>
    %16 = tpu.matmul %8, %15, %cst_12 {dimension_numbers = #tpu.dot_dimension_numbers<[1], [0], [0], [1], [0, 0, 1, 1], [], []>} : vector<8x32xbf16>, vector<32x32xbf16>, vector<8x32xf32> -> vector<8x32xf32>
    %c0_13 = arith.constant 0 : index
    %c0_14 = arith.constant 0 : index
    %17 = vector.load %arg12[%c0_13, %c0_14] : memref<1x32xf32, #tpu.memory_space<vmem>>, vector<1x32xf32>
    %18 = vector.broadcast %17 : vector<1x32xf32> to vector<8x32xf32>
    %19 = arith.addf %16, %18 : vector<8x32xf32>
    %20 = arith.truncf %19 : vector<8x32xf32> to vector<8x32xbf16>
    %21 = vector.extract_strided_slice %14 {offsets = [0, 0], sizes = [8, 8], strides = [1, 1]} : vector<8x32xbf16> to vector<8x8xbf16>
    %c0_15 = arith.constant 0 : index
    %c0_16 = arith.constant 0 : index
    %c0_17 = arith.constant 0 : index
    %22 = vector.load %arg19[%c0_15, %c0_16, %c0_17] : memref<4x8x8xbf16, #tpu.memory_space<vmem>>, vector<1x8x8xbf16>
    %23 = vector.shape_cast %22 : vector<1x8x8xbf16> to vector<8x8xbf16>
    %24 = vector.shape_cast %21 : vector<8x8xbf16> to vector<1x8x8xbf16>
    tpu.vector_store %arg19[%c0_15, %c0_16, %c0_17], %24 {strides = array<i32>} : memref<4x8x8xbf16, #tpu.memory_space<vmem>>, vector<1x8x8xbf16>,
    %25 = vector.extract_strided_slice %20 {offsets = [0, 0], sizes = [8, 8], strides = [1, 1]} : vector<8x32xbf16> to vector<8x8xbf16>
    %c0_18 = arith.constant 0 : index
    %c0_19 = arith.constant 0 : index
    %c0_20 = arith.constant 0 : index
    %26 = vector.load %arg20[%c0_18, %c0_19, %c0_20] : memref<4x8x8xbf16, #tpu.memory_space<vmem>>, vector<1x8x8xbf16>
    %27 = vector.shape_cast %26 : vector<1x8x8xbf16> to vector<8x8xbf16>
    %28 = vector.shape_cast %25 : vector<8x8xbf16> to vector<1x8x8xbf16>
    tpu.vector_store %arg20[%c0_18, %c0_19, %c0_20], %28 {strides = array<i32>} : memref<4x8x8xbf16, #tpu.memory_space<vmem>>, vector<1x8x8xbf16>,
    %29 = vector.extract_strided_slice %14 {offsets = [0, 8], sizes = [8, 8], strides = [1, 1]} : vector<8x32xbf16> to vector<8x8xbf16>
    %c1 = arith.constant 1 : index
    %c0_21 = arith.constant 0 : index
    %c0_22 = arith.constant 0 : index
    %30 = vector.load %arg19[%c1, %c0_21, %c0_22] : memref<4x8x8xbf16, #tpu.memory_space<vmem>>, vector<1x8x8xbf16>
    %31 = vector.shape_cast %30 : vector<1x8x8xbf16> to vector<8x8xbf16>
    %32 = vector.shape_cast %29 : vector<8x8xbf16> to vector<1x8x8xbf16>
    tpu.vector_store %arg19[%c1, %c0_21, %c0_22], %32 {strides = array<i32>} : memref<4x8x8xbf16, #tpu.memory_space<vmem>>, vector<1x8x8xbf16>,
    %33 = vector.extract_strided_slice %20 {offsets = [0, 8], sizes = [8, 8], strides = [1, 1]} : vector<8x32xbf16> to vector<8x8xbf16>
    %c1_23 = arith.constant 1 : index
    %c0_24 = arith.constant 0 : index
    %c0_25 = arith.constant 0 : index
    %34 = vector.load %arg20[%c1_23, %c0_24, %c0_25] : memref<4x8x8xbf16, #tpu.memory_space<vmem>>, vector<1x8x8xbf16>
    %35 = vector.shape_cast %34 : vector<1x8x8xbf16> to vector<8x8xbf16>
    %36 = vector.shape_cast %33 : vector<8x8xbf16> to vector<1x8x8xbf16>
    tpu.vector_store %arg20[%c1_23, %c0_24, %c0_25], %36 {strides = array<i32>} : memref<4x8x8xbf16, #tpu.memory_space<vmem>>, vector<1x8x8xbf16>,
    %37 = vector.extract_strided_slice %14 {offsets = [0, 16], sizes = [8, 8], strides = [1, 1]} : vector<8x32xbf16> to vector<8x8xbf16>
    %c2 = arith.constant 2 : index
    %c0_26 = arith.constant 0 : index
    %c0_27 = arith.constant 0 : index
    %38 = vector.load %arg19[%c2, %c0_26, %c0_27] : memref<4x8x8xbf16, #tpu.memory_space<vmem>>, vector<1x8x8xbf16>
    %39 = vector.shape_cast %38 : vector<1x8x8xbf16> to vector<8x8xbf16>
    %40 = vector.shape_cast %37 : vector<8x8xbf16> to vector<1x8x8xbf16>
    tpu.vector_store %arg19[%c2, %c0_26, %c0_27], %40 {strides = array<i32>} : memref<4x8x8xbf16, #tpu.memory_space<vmem>>, vector<1x8x8xbf16>,
    %41 = vector.extract_strided_slice %20 {offsets = [0, 16], sizes = [8, 8], strides = [1, 1]} : vector<8x32xbf16> to vector<8x8xbf16>
    %c2_28 = arith.constant 2 : index
    %c0_29 = arith.constant 0 : index
    %c0_30 = arith.constant 0 : index
    %42 = vector.load %arg20[%c2_28, %c0_29, %c0_30] : memref<4x8x8xbf16, #tpu.memory_space<vmem>>, vector<1x8x8xbf16>
    %43 = vector.shape_cast %42 : vector<1x8x8xbf16> to vector<8x8xbf16>
    %44 = vector.shape_cast %41 : vector<8x8xbf16> to vector<1x8x8xbf16>
    tpu.vector_store %arg20[%c2_28, %c0_29, %c0_30], %44 {strides = array<i32>} : memref<4x8x8xbf16, #tpu.memory_space<vmem>>, vector<1x8x8xbf16>,
    %45 = vector.extract_strided_slice %14 {offsets = [0, 24], sizes = [8, 8], strides = [1, 1]} : vector<8x32xbf16> to vector<8x8xbf16>
    %c3 = arith.constant 3 : index
    %c0_31 = arith.constant 0 : index
    %c0_32 = arith.constant 0 : index
    %46 = vector.load %arg19[%c3, %c0_31, %c0_32] : memref<4x8x8xbf16, #tpu.memory_space<vmem>>, vector<1x8x8xbf16>
    %47 = vector.shape_cast %46 : vector<1x8x8xbf16> to vector<8x8xbf16>
    %48 = vector.shape_cast %45 : vector<8x8xbf16> to vector<1x8x8xbf16>
    tpu.vector_store %arg19[%c3, %c0_31, %c0_32], %48 {strides = array<i32>} : memref<4x8x8xbf16, #tpu.memory_space<vmem>>, vector<1x8x8xbf16>,
    %49 = vector.extract_strided_slice %20 {offsets = [0, 24], sizes = [8, 8], strides = [1, 1]} : vector<8x32xbf16> to vector<8x8xbf16>
    %c3_33 = arith.constant 3 : index
    %c0_34 = arith.constant 0 : index
    %c0_35 = arith.constant 0 : index
    %50 = vector.load %arg20[%c3_33, %c0_34, %c0_35] : memref<4x8x8xbf16, #tpu.memory_space<vmem>>, vector<1x8x8xbf16>
    %51 = vector.shape_cast %50 : vector<1x8x8xbf16> to vector<8x8xbf16>
    %52 = vector.shape_cast %49 : vector<8x8xbf16> to vector<1x8x8xbf16>
    tpu.vector_store %arg20[%c3_33, %c0_34, %c0_35], %52 {strides = array<i32>} : memref<4x8x8xbf16, #tpu.memory_space<vmem>>, vector<1x8x8xbf16>,
    %c0_36 = arith.constant 0 : index
    %c0_37 = arith.constant 0 : index
    %c0_38 = arith.constant 0 : index
    %53 = vector.load %arg18[%c0_36, %c0_37, %c0_38] : memref<4x8x8xbf16, #tpu.memory_space<vmem>>, vector<4x8x8xbf16>
    %c0_39 = arith.constant 0 : index
    %c0_40 = arith.constant 0 : index
    %c0_41 = arith.constant 0 : index
    %54 = vector.load %arg19[%c0_39, %c0_40, %c0_41] : memref<4x8x8xbf16, #tpu.memory_space<vmem>>, vector<4x8x8xbf16>
    "tpu.trace_start"() <{level = 10 : i32, message = "hqd,hkd->hqk"}> : () -> ()
    %cst_42 = arith.constant dense<0.000000e+00> : vector<4x8x8xf32>
    %55 = tpu.matmul %53, %54, %cst_42 {dimension_numbers = #tpu.dot_dimension_numbers<[2], [2], [1], [1], [0, 0, 0, 1, 1, 1], [0], [0]>} : vector<4x8x8xbf16>, vector<4x8x8xbf16>, vector<4x8x8xf32> -> vector<4x8x8xf32>
    "tpu.trace_stop"() : () -> ()
    %c0_43 = arith.constant 0 : index
    %c0_44 = arith.constant 0 : index
    %c0_45 = arith.constant 0 : index
    %56 = vector.load %arg21[%c0_43, %c0_44, %c0_45] : memref<4x8x1xf32, #tpu.memory_space<vmem>>, vector<4x8x1xf32>
    %cst_46 = arith.constant dense<0xFF800000> : vector<4x8xf32>
    %57 = vector.multi_reduction <maximumf>, %55, %cst_46 [2] : vector<4x8x8xf32> to vector<4x8xf32>
    %58 = vector.shape_cast %57 : vector<4x8xf32> to vector<4x8x1xf32>
    %59 = arith.maximumf %56, %58 : vector<4x8x1xf32>
    %60 = arith.subf %56, %59 : vector<4x8x1xf32>
    %61 = math.exp %60 : vector<4x8x1xf32>
    %62 = vector.broadcast %59 : vector<4x8x1xf32> to vector<4x8x8xf32>
    %63 = arith.subf %55, %62 : vector<4x8x8xf32>
    %64 = math.exp %63 : vector<4x8x8xf32>
    %c0_47 = arith.constant 0 : index
    %c0_48 = arith.constant 0 : index
    %c0_49 = arith.constant 0 : index
    %65 = vector.load %arg22[%c0_47, %c0_48, %c0_49] : memref<4x8x1xf32, #tpu.memory_space<vmem>>, vector<4x8x1xf32>
    %66 = arith.mulf %61, %65 : vector<4x8x1xf32>
    %cst_50 = arith.constant dense<0.000000e+00> : vector<4x8xf32>
    %67 = vector.multi_reduction <add>, %64, %cst_50 [2] : vector<4x8x8xf32> to vector<4x8xf32>
    %68 = vector.shape_cast %67 : vector<4x8xf32> to vector<4x8x1xf32>
    %69 = arith.addf %66, %68 : vector<4x8x1xf32>
    %c0_51 = arith.constant 0 : index
    %c0_52 = arith.constant 0 : index
    %c0_53 = arith.constant 0 : index
    %70 = vector.load %arg22[%c0_51, %c0_52, %c0_53] : memref<4x8x1xf32, #tpu.memory_space<vmem>>, vector<4x8x1xf32>
    tpu.vector_store %arg22[%c0_51, %c0_52, %c0_53], %69 {strides = array<i32>} : memref<4x8x1xf32, #tpu.memory_space<vmem>>, vector<4x8x1xf32>,
    %c0_54 = arith.constant 0 : index
    %c0_55 = arith.constant 0 : index
    %c0_56 = arith.constant 0 : index
    %71 = vector.load %arg23[%c0_54, %c0_55, %c0_56] : memref<4x8x8xf32, #tpu.memory_space<vmem>>, vector<4x8x8xf32>
    %72 = vector.broadcast %61 : vector<4x8x1xf32> to vector<4x8x8xf32>
    %73 = arith.mulf %72, %71 : vector<4x8x8xf32>
    %74 = arith.truncf %64 : vector<4x8x8xf32> to vector<4x8x8xbf16>
    %c0_57 = arith.constant 0 : index
    %c0_58 = arith.constant 0 : index
    %c0_59 = arith.constant 0 : index
    %75 = vector.load %arg20[%c0_57, %c0_58, %c0_59] : memref<4x8x8xbf16, #tpu.memory_space<vmem>>, vector<4x8x8xbf16>
    "tpu.trace_start"() <{level = 10 : i32, message = "hqk,hkd->hqd"}> : () -> ()
    %cst_60 = arith.constant dense<0.000000e+00> : vector<4x8x8xf32>
    %76 = tpu.matmul %74, %75, %cst_60 {dimension_numbers = #tpu.dot_dimension_numbers<[2], [1], [1], [2], [0, 0, 0, 1, 1, 2], [0], [0]>} : vector<4x8x8xbf16>, vector<4x8x8xbf16>, vector<4x8x8xf32> -> vector<4x8x8xf32>
    "tpu.trace_stop"() : () -> ()
    %77 = arith.addf %73, %76 : vector<4x8x8xf32>
    %c0_61 = arith.constant 0 : index
    %c0_62 = arith.constant 0 : index
    %c0_63 = arith.constant 0 : index
    %78 = vector.load %arg23[%c0_61, %c0_62, %c0_63] : memref<4x8x8xf32, #tpu.memory_space<vmem>>, vector<4x8x8xf32>
    tpu.vector_store %arg23[%c0_61, %c0_62, %c0_63], %77 {strides = array<i32>} : memref<4x8x8xf32, #tpu.memory_space<vmem>>, vector<4x8x8xf32>,
    %c0_64 = arith.constant 0 : index
    %c0_65 = arith.constant 0 : index
    %c0_66 = arith.constant 0 : index
    %79 = vector.load %arg21[%c0_64, %c0_65, %c0_66] : memref<4x8x1xf32, #tpu.memory_space<vmem>>, vector<4x8x1xf32>
    tpu.vector_store %arg21[%c0_64, %c0_65, %c0_66], %59 {strides = array<i32>} : memref<4x8x1xf32, #tpu.memory_space<vmem>>, vector<4x8x1xf32>,
    %c0_i32_67 = arith.constant 0 : i32
    %80 = arith.cmpi eq, %arg2, %c0_i32_67 : i32
    %81 = arith.extui %80 : i1 to i32
    %c0_i32_68 = arith.constant 0 : i32
    %82 = arith.cmpi ne, %81, %c0_i32_68 : i32
    scf.if %82 {
      %c0_69 = arith.constant 0 : index
      %c0_70 = arith.constant 0 : index
      %c0_71 = arith.constant 0 : index
      %83 = vector.load %arg23[%c0_69, %c0_70, %c0_71] : memref<4x8x8xf32, #tpu.memory_space<vmem>>, vector<4x8x8xf32>
      %c0_72 = arith.constant 0 : index
      %c0_73 = arith.constant 0 : index
      %c0_74 = arith.constant 0 : index
      %84 = vector.load %arg22[%c0_72, %c0_73, %c0_74] : memref<4x8x1xf32, #tpu.memory_space<vmem>>, vector<4x8x1xf32>
      %85 = vector.broadcast %84 : vector<4x8x1xf32> to vector<4x8x8xf32>
      %86 = arith.divf %83, %85 : vector<4x8x8xf32>
      %87 = arith.truncf %86 : vector<4x8x8xf32> to vector<4x8x8xbf16>
      %88 = vector.extract_strided_slice %87 {offsets = [0, 0, 0], sizes = [1, 8, 8], strides = [1, 1, 1]} : vector<4x8x8xbf16> to vector<1x8x8xbf16>
      %89 = vector.shape_cast %88 : vector<1x8x8xbf16> to vector<8x8xbf16>
      %c0_75 = arith.constant 0 : index
      %c0_76 = arith.constant 0 : index
      %c0_77 = arith.constant 0 : index
      %90 = vector.load %arg13[%c0_75, %c0_76, %c0_77] : memref<4x8x32xbf16, #tpu.memory_space<vmem>>, vector<1x8x32xbf16>
      %91 = vector.shape_cast %90 : vector<1x8x32xbf16> to vector<8x32xbf16>
      %cst_78 = arith.constant dense<0.000000e+00> : vector<8x32xf32>
      %92 = tpu.matmul %89, %91, %cst_78 {dimension_numbers = #tpu.dot_dimension_numbers<[1], [0], [0], [1], [0, 0, 1, 1], [], []>} : vector<8x8xbf16>, vector<8x32xbf16>, vector<8x32xf32> -> vector<8x32xf32>
      %93 = vector.extract_strided_slice %87 {offsets = [1, 0, 0], sizes = [1, 8, 8], strides = [1, 1, 1]} : vector<4x8x8xbf16> to vector<1x8x8xbf16>
      %94 = vector.shape_cast %93 : vector<1x8x8xbf16> to vector<8x8xbf16>
      %c1_79 = arith.constant 1 : index
      %c0_80 = arith.constant 0 : index
      %c0_81 = arith.constant 0 : index
      %95 = vector.load %arg13[%c1_79, %c0_80, %c0_81] : memref<4x8x32xbf16, #tpu.memory_space<vmem>>, vector<1x8x32xbf16>
      %96 = vector.shape_cast %95 : vector<1x8x32xbf16> to vector<8x32xbf16>
      %cst_82 = arith.constant dense<0.000000e+00> : vector<8x32xf32>
      %97 = tpu.matmul %94, %96, %cst_82 {dimension_numbers = #tpu.dot_dimension_numbers<[1], [0], [0], [1], [0, 0, 1, 1], [], []>} : vector<8x8xbf16>, vector<8x32xbf16>, vector<8x32xf32> -> vector<8x32xf32>
      %98 = arith.addf %92, %97 : vector<8x32xf32>
      %99 = vector.extract_strided_slice %87 {offsets = [2, 0, 0], sizes = [1, 8, 8], strides = [1, 1, 1]} : vector<4x8x8xbf16> to vector<1x8x8xbf16>
      %100 = vector.shape_cast %99 : vector<1x8x8xbf16> to vector<8x8xbf16>
      %c2_83 = arith.constant 2 : index
      %c0_84 = arith.constant 0 : index
      %c0_85 = arith.constant 0 : index
      %101 = vector.load %arg13[%c2_83, %c0_84, %c0_85] : memref<4x8x32xbf16, #tpu.memory_space<vmem>>, vector<1x8x32xbf16>
      %102 = vector.shape_cast %101 : vector<1x8x32xbf16> to vector<8x32xbf16>
      %cst_86 = arith.constant dense<0.000000e+00> : vector<8x32xf32>
      %103 = tpu.matmul %100, %102, %cst_86 {dimension_numbers = #tpu.dot_dimension_numbers<[1], [0], [0], [1], [0, 0, 1, 1], [], []>} : vector<8x8xbf16>, vector<8x32xbf16>, vector<8x32xf32> -> vector<8x32xf32>
      %104 = arith.addf %98, %103 : vector<8x32xf32>
      %105 = vector.extract_strided_slice %87 {offsets = [3, 0, 0], sizes = [1, 8, 8], strides = [1, 1, 1]} : vector<4x8x8xbf16> to vector<1x8x8xbf16>
      %106 = vector.shape_cast %105 : vector<1x8x8xbf16> to vector<8x8xbf16>
      %c3_87 = arith.constant 3 : index
      %c0_88 = arith.constant 0 : index
      %c0_89 = arith.constant 0 : index
      %107 = vector.load %arg13[%c3_87, %c0_88, %c0_89] : memref<4x8x32xbf16, #tpu.memory_space<vmem>>, vector<1x8x32xbf16>
      %108 = vector.shape_cast %107 : vector<1x8x32xbf16> to vector<8x32xbf16>
      %cst_90 = arith.constant dense<0.000000e+00> : vector<8x32xf32>
      %109 = tpu.matmul %106, %108, %cst_90 {dimension_numbers = #tpu.dot_dimension_numbers<[1], [0], [0], [1], [0, 0, 1, 1], [], []>} : vector<8x8xbf16>, vector<8x32xbf16>, vector<8x32xf32> -> vector<8x32xf32>
      %110 = arith.addf %104, %109 : vector<8x32xf32>
      %c0_91 = arith.constant 0 : index
      %c0_92 = arith.constant 0 : index
      %111 = vector.load %arg14[%c0_91, %c0_92] : memref<1x32xf32, #tpu.memory_space<vmem>>, vector<1x32xf32>
      %112 = vector.broadcast %111 : vector<1x32xf32> to vector<8x32xf32>
      %113 = arith.addf %110, %112 : vector<8x32xf32>
      %c0_93 = arith.constant 0 : index
      %c0_94 = arith.constant 0 : index
      %c0_95 = arith.constant 0 : index
      %114 = vector.load %arg6[%c0_93, %c0_94, %c0_95] : memref<1x8x32xf32, #tpu.memory_space<vmem>>, vector<1x8x32xf32>
      %115 = vector.shape_cast %114 : vector<1x8x32xf32> to vector<8x32xf32>
      %116 = arith.addf %113, %115 : vector<8x32xf32>
      %cst_96 = arith.constant dense<0.000000e+00> : vector<8xf32>
      %117 = vector.multi_reduction <add>, %116, %cst_96 [1] : vector<8x32xf32> to vector<8xf32>
      %118 = vector.shape_cast %117 : vector<8xf32> to vector<8x1xf32>
      %cst_97 = arith.constant 3.200000e+01 : f32
      %119 = vector.broadcast %cst_97 : f32 to vector<8x1xf32>
      %120 = arith.divf %118, %119 : vector<8x1xf32>
      %121 = vector.broadcast %120 : vector<8x1xf32> to vector<8x32xf32>
      %122 = arith.subf %116, %121 : vector<8x32xf32>
      %123 = arith.mulf %122, %122 : vector<8x32xf32>
      %cst_98 = arith.constant dense<0.000000e+00> : vector<8xf32>
      %124 = vector.multi_reduction <add>, %123, %cst_98 [1] : vector<8x32xf32> to vector<8xf32>
      %125 = vector.shape_cast %124 : vector<8xf32> to vector<8x1xf32>
      %cst_99 = arith.constant 3.200000e+01 : f32
      %126 = vector.broadcast %cst_99 : f32 to vector<8x1xf32>
      %127 = arith.divf %125, %126 : vector<8x1xf32>
      %128 = vector.broadcast %120 : vector<8x1xf32> to vector<8x32xf32>
      %129 = arith.subf %116, %128 : vector<8x32xf32>
      %cst_100 = arith.constant 9.99999974E-6 : f32
      %130 = vector.broadcast %cst_100 : f32 to vector<8x1xf32>
      %131 = arith.addf %127, %130 : vector<8x1xf32>
      %132 = math.rsqrt %131 : vector<8x1xf32>
      %133 = vector.broadcast %132 : vector<8x1xf32> to vector<8x32xf32>
      %134 = arith.mulf %129, %133 : vector<8x32xf32>
      %c0_101 = arith.constant 0 : index
      %c0_102 = arith.constant 0 : index
      %135 = vector.load %arg15[%c0_101, %c0_102] : memref<1x32xf32, #tpu.memory_space<vmem>>, vector<1x32xf32>
      %136 = vector.broadcast %135 : vector<1x32xf32> to vector<8x32xf32>
      %137 = arith.mulf %134, %136 : vector<8x32xf32>
      %c0_103 = arith.constant 0 : index
      %c0_104 = arith.constant 0 : index
      %138 = vector.load %arg16[%c0_103, %c0_104] : memref<1x32xf32, #tpu.memory_space<vmem>>, vector<1x32xf32>
      %139 = vector.broadcast %138 : vector<1x32xf32> to vector<8x32xf32>
      %140 = arith.addf %137, %139 : vector<8x32xf32>
      %c0_105 = arith.constant 0 : index
      %c0_106 = arith.constant 0 : index
      %c0_107 = arith.constant 0 : index
      %141 = vector.load %arg17[%c0_105, %c0_106, %c0_107] : memref<1x8x32xf32, #tpu.memory_space<vmem>>, vector<1x8x32xf32>
      %142 = vector.shape_cast %141 : vector<1x8x32xf32> to vector<8x32xf32>
      %143 = vector.shape_cast %140 : vector<8x32xf32> to vector<1x8x32xf32>
      tpu.vector_store %arg17[%c0_105, %c0_106, %c0_107], %143 {strides = array<i32>} : memref<1x8x32xf32, #tpu.memory_space<vmem>>, vector<1x8x32xf32>,
    } else {
    }
    return
  }
  func.func @transform_0(%arg0: i32, %arg1: i32, %arg2: i32) -> (i32, i32, i32) {
    %c0_i32 = arith.constant 0 : i32
    %c0_i32_0 = arith.constant 0 : i32
    return %arg0, %arg1, %c0_i32 : i32, i32, i32
  }
  func.func @transform_1(%arg0: i32, %arg1: i32, %arg2: i32) -> (i32, i32, i32) {
    %c0_i32 = arith.constant 0 : i32
    %c0_i32_0 = arith.constant 0 : i32
    return %arg0, %arg2, %c0_i32 : i32, i32, i32
  }
  func.func @transform_2(%arg0: i32, %arg1: i32, %arg2: i32) -> (i32, i32, i32) {
    %c0_i32 = arith.constant 0 : i32
    %c0_i32_0 = arith.constant 0 : i32
    return %arg0, %arg2, %c0_i32 : i32, i32, i32
  }
  func.func @transform_3(%arg0: i32, %arg1: i32, %arg2: i32) -> (i32, i32, i32) {
    %c0_i32 = arith.constant 0 : i32
    %c0_i32_0 = arith.constant 0 : i32
    return %arg0, %arg1, %c0_i32 : i32, i32, i32
  }
  func.func @transform_4(%arg0: i32, %arg1: i32, %arg2: i32) -> (i32, i32) {
    %c0_i32 = arith.constant 0 : i32
    %c0_i32_0 = arith.constant 0 : i32
    %c0_i32_1 = arith.constant 0 : i32
    return %c0_i32, %c0_i32_0 : i32, i32
  }
  func.func @transform_5(%arg0: i32, %arg1: i32, %arg2: i32) -> (i32, i32) {
    %c0_i32 = arith.constant 0 : i32
    %c0_i32_0 = arith.constant 0 : i32
    %c0_i32_1 = arith.constant 0 : i32
    return %c0_i32, %c0_i32_0 : i32, i32
  }
  func.func @transform_6(%arg0: i32, %arg1: i32, %arg2: i32) -> (i32, i32) {
    %c0_i32 = arith.constant 0 : i32
    %c0_i32_0 = arith.constant 0 : i32
    %c0_i32_1 = arith.constant 0 : i32
    return %c0_i32, %c0_i32_0 : i32, i32
  }
  func.func @transform_7(%arg0: i32, %arg1: i32, %arg2: i32) -> (i32, i32) {
    %c0_i32 = arith.constant 0 : i32
    %c0_i32_0 = arith.constant 0 : i32
    %c0_i32_1 = arith.constant 0 : i32
    return %c0_i32, %c0_i32_0 : i32, i32
  }
  func.func @transform_8(%arg0: i32, %arg1: i32, %arg2: i32) -> (i32, i32) {
    %c0_i32 = arith.constant 0 : i32
    %c0_i32_0 = arith.constant 0 : i32
    %c0_i32_1 = arith.constant 0 : i32
    return %c0_i32, %c0_i32_0 : i32, i32
  }
  func.func @transform_9(%arg0: i32, %arg1: i32, %arg2: i32) -> (i32, i32) {
    %c0_i32 = arith.constant 0 : i32
    %c0_i32_0 = arith.constant 0 : i32
    %c0_i32_1 = arith.constant 0 : i32
    return %c0_i32, %c0_i32_0 : i32, i32
  }
  func.func @transform_10(%arg0: i32, %arg1: i32, %arg2: i32) -> (i32, i32, i32) {
    %c0_i32 = arith.constant 0 : i32
    %c0_i32_0 = arith.constant 0 : i32
    %c0_i32_1 = arith.constant 0 : i32
    %c0_i32_2 = arith.constant 0 : i32
    return %c0_i32, %c0_i32_0, %c0_i32_1 : i32, i32, i32
  }
  func.func @transform_11(%arg0: i32, %arg1: i32, %arg2: i32) -> (i32, i32) {
    %c0_i32 = arith.constant 0 : i32
    %c0_i32_0 = arith.constant 0 : i32
    %c0_i32_1 = arith.constant 0 : i32
    return %c0_i32, %c0_i32_0 : i32, i32
  }
  func.func @transform_12(%arg0: i32, %arg1: i32, %arg2: i32) -> (i32, i32) {
    %c0_i32 = arith.constant 0 : i32
    %c0_i32_0 = arith.constant 0 : i32
    %c0_i32_1 = arith.constant 0 : i32
    return %c0_i32, %c0_i32_0 : i32, i32
  }
  func.func @transform_13(%arg0: i32, %arg1: i32, %arg2: i32) -> (i32, i32) {
    %c0_i32 = arith.constant 0 : i32
    %c0_i32_0 = arith.constant 0 : i32
    %c0_i32_1 = arith.constant 0 : i32
    return %c0_i32, %c0_i32_0 : i32, i32
  }
  func.func @transform_14(%arg0: i32, %arg1: i32, %arg2: i32) -> (i32, i32, i32) {
    %c0_i32 = arith.constant 0 : i32
    %c0_i32_0 = arith.constant 0 : i32
    return %arg0, %arg1, %c0_i32 : i32, i32, i32
  }
}

</mosaic_0001>

<bundles_post_ra>
// kernel: tpu_custom_call.1
= control target key start
LH: loop header
LB: loop body
LE: loop exit
PB: predicated region body
PF: predicated region fallthrough
CT: control target
= control target key end

     0   :  { %s3883_s0 = inlined_call_operand.hbm [shape: f32[2,8,32], index: 0, kind: input, shape index: {}]   ;;  %s3884_s1 = inlined_call_operand.hbm [shape: f32[2,8,32], index: 1, kind: input, shape index: {}]   ;;  %s3885_s2 = inlined_call_operand.hbm [shape: f32[2,8,32], index: 2, kind: input, shape index: {}]   ;;  %s3886_s3 = inlined_call_operand.hbm [shape: f32[2,8,32], index: 3, kind: input, shape index: {}]   ;;  %s3887_s4 = inlined_call_operand.hbm [shape: bf16[32,32], index: 4, kind: input, shape index: {}]   ;;  %s3888_s5 = inlined_call_operand.hbm [shape: f32[1,32], index: 5, kind: input, shape index: {}]   ;;  %s3889_s6 = inlined_call_operand.hbm [shape: bf16[32,32], index: 6, kind: input, shape index: {}]   ;;  %s3890_s7 = inlined_call_operand.hbm [shape: f32[1,32], index: 7, kind: input, shape index: {}]   ;;  %s3891_s8 = inlined_call_operand.hbm [shape: bf16[32,32], index: 8, kind: input, shape index: {}]   ;;  %s3892_s9 = inlined_call_operand.hbm [shape: f32[1,32], index: 9, kind: input, shape index: {}]   ;;  %s3893_s10 = inlined_call_operand.hbm [shape: bf16[4,8,32], index: 10, kind: input, shape index: {}]   ;;  %s3894_s11 = inlined_call_operand.hbm [shape: f32[1,32], index: 11, kind: input, shape index: {}]   ;;  %s3895_s12 = inlined_call_operand.hbm [shape: f32[1,32], index: 12, kind: input, shape index: {}]   ;;  %s3896_s13 = inlined_call_operand.hbm [shape: f32[1,32], index: 13, kind: input, shape index: {}]   ;;  %s3897_s14 = inlined_call_operand.hbm [shape: f32[2,8,32], index: 14, kind: output, shape index: {}]  }
   0x1   :  { %3926 = sst [smem:[#allocation48_spill]] %s3883_s0 }
   0x2   :  { %3927 = sst [smem:[#allocation49_spill]] %s3884_s1 }
   0x3   :  { %3928 = sst [smem:[#allocation50_spill]] %s3885_s2 }
   0x4   :  { %3929 = sst [smem:[#allocation51_spill]] %s3886_s3 }
   0x5   :  { %3930 = sst [smem:[#allocation52_spill]] %s3887_s4 }
   0x6   :  { %3931 = sst [smem:[#allocation53_spill]] %s3888_s5 }
   0x7   :  { %3932 = sst [smem:[#allocation54_spill]] %s3889_s6 }
   0x8   :  { %3933 = sst [smem:[#allocation55_spill]] %s3890_s7 }
   0x9   :  { %3934 = sst [smem:[#allocation56_spill]] %s3892_s9 }
   0xa   :  { %3935 = sst [smem:[#allocation57_spill]] %s3894_s11 }
   0xb   :  { %3936 = sst [smem:[#allocation58_spill]] %s3895_s12 }
   0xc   :  { %3937 = sst [smem:[#allocation59_spill]] %s3896_s13 }
   0xd   :  { %3938 = sst [smem:[#allocation60_spill]] %s3897_s14 }
   0xe   :  { %19 = vsyncpa [#allocation9], 0 }
   0xf   :  { %21 = vsyncpa [#allocation9 + $0x1], 0 }
  0x10   :  { %22 = vsyncpa [#allocation12], 0 }
  0x11   :  { %24 = vsyncpa [#allocation12 + $0x1], 0 }
  0x12   :  { %25 = vsyncpa [#allocation15], 0 }
  0x13   :  { %27 = vsyncpa [#allocation15 + $0x1], 0 }
  0x14   :  { %28 = vsyncpa [#allocation18], 0 }
  0x15   :  { %29 = vsyncpa [#allocation21], 0 }
  0x16   :  { %30 = vsyncpa [#allocation24], 0 }
  0x17   :  { %31 = vsyncpa [#allocation27], 0 }
  0x18   :  { %32 = vsyncpa [#allocation30], 0 }
  0x19   :  { %33 = vsyncpa [#allocation10], 0 }
  0x1a   :  { %35 = vsyncpa [#allocation10 + $0x1], 0  ;;  %s3142_s29 = smov 0   ;;  %s3144_s30 = smov 0  }
  0x1b   :  { %s3146_s15 = smov 0   ;;  %s3148_s16 = smov 0  }
  0x1c   :  { %s3150_s17 = smov 0   ;;  %s3152_s18 = smov 0  }
  0x1d LB: > { %3939 = sst [smem:[#allocation42_spill]] %s3033_s16  ;;  %s3173_s19 = sadd.s32 4294967295, %s3041_s18   ;;  %s3041_s18 = sphi %s3152_s18, %s41_s18   ;;  %s3037_s17 = sphi %s3150_s17, %s4000_s17   ;;  %s3033_s16 = sphi %s3148_s16, %s3999_s16   ;;  %s3029_s15 = sphi %s3146_s15, %s4003_s15   ;;  %s3025_s30 = sphi %s3144_s30, %s4002_s30   ;;  %s3021_s29 = sphi %s3142_s29, %s4001_s29  }
  0x1e   : > { %3940 = sst [smem:[#allocation43_spill]] %s3037_s17  ;;  %p2104_p0 = scmp.ge.s32.totalorder %s3041_s18, 1 }
  0x1f   : > { %p3905_p1 = scmp.eq.s32.totalorder %s3173_s19, 0  ;;  %p415_p2 = scmp.lt.s32.totalorder %s3041_s18, 3 }
  0x20   : > { %s3043_s21 = smov [#allocation16]   ;;  %s3044_s24 = smov [#allocation17]  }
  0x21   : > { %p3178_p3 = pnand %p2104_p0, %p415_p2  ;;  %s427_s22 = sshll.u32 %s3043_s21, 4  ;;  %s3182_s22 = int_to_ptr.vmem [resolvable:$true] %s427_s22 }
  0x22   : > { %s441_s25 = sshll.u32 %s3044_s24, 4  ;;  %s3045_s26 = smov [#allocation20]   ;;  %s3193_s25 = int_to_ptr.vmem [resolvable:$true] %s441_s25 }
  0x23   : > { %s3941_s20 = scalar_select %p3178_p3, 1, 0 }
  0x24   : > { %p2356_p4 = pneg %p3178_p3  ;;  %s3195_s27 = sshll.u32 %s3045_s26, 4  ;;  %s466_s27 = int_to_ptr.vmem [resolvable:$true] %s3195_s27 }
  0x25   : > { %3942 = sst [smem:[#allocation44_spill]] %s3941_s20  ;;  %s3944_s4 = sld [smem:[#allocation52_spill]] }
  0x26   : > { %p3189_p6 = pnand %p2356_p4, %p3905_p1 }
  0x28   : > { %s3943_s23 = scalar_select %p3189_p6, 1, 0 }
  0x29   : > { %p3205_p8 = pneg %p3189_p6 }
  0x2b   : > { %s2527_s14 = scalar_lea.hbm %s3944_s4, 256 }
  0x2c   : > { %p2528_p7 = scmp.ne.s32.totalorder %s3944_s4, %s2527_s14  ;;  %p2534_p11 = scmp.lt.u32.totalorder %s2527_s14, %s3944_s4 }
  0x2d   : > { %s3945_s3 = scalar_select %p3205_p8, 1, 0 }
  0x2e   : > { %p2530_p9 = pnand %p3205_p8, %p2528_p7 }
  0x30   : > { %p2531_p10 = pneg %p2530_p9 }
  0x32   : > { %p2536_p12 = pnand %p2534_p11, %p2531_p10 }
  0x34   : > { %2539 = shalt.err (!%p2536_p12)
}
  0x35   : > { %s2540_s16 = scalar_lea.vmem %s3182_s22, 256  ;;  %p2548_p4 = scmp.lt.s32.totalorder %s3182_s22, %s3182_s22 }
  0x36   : > { %p2541_p13 = scmp.ne.s32.totalorder %s3182_s22, %s2540_s16  ;;  %p2549_p5 = scmp.lt.s32.totalorder %s2540_s16, %s2540_s16 }
  0x38   : > { %p2543_p0 = pnand %p2541_p13, %p3205_p8  ;;  %p2550_p7 = por %p2549_p5, %p2548_p4 }
  0x3a   : > { %p2544_p2 = pneg %p2543_p0 }
  0x3c   : > { %p2551_p9 = pnand %p2550_p7, %p2544_p2 }
  0x3e   : > { %2554 = shalt.err (!%p2551_p9)
}
  0x3f   : > { %s3907_s20 = smov 64   ;;  %s3909_s14 = smov 4  }
  0x40   : > { %2359 = dma.hbm_to_vmem [thread:$0]  (!%p3189_p6), %s3944_s4, 256, %s3182_s22, [#allocation15], %s3907_s20, %s3907_s20, %s3909_s14  }
  0x41   : > { %s3946_s5 = sld [smem:[#allocation53_spill]] }
  0x47   : > { %s2555_s16 = scalar_lea.hbm %s3946_s5, 16 }
  0x48   : > { %p2556_p5 = scmp.ne.s32.totalorder %s3946_s5, %s2555_s16  ;;  %p2562_p12 = scmp.lt.u32.totalorder %s2555_s16, %s3946_s5 }
  0x4a   : > { %p2558_p10 = pnand %p2556_p5, %p3205_p8 }
  0x4c   : > { %p2559_p11 = pneg %p2558_p10 }
  0x4e   : > { %p2564_p13 = pnand %p2562_p12, %p2559_p11 }
  0x50   : > { %2567 = shalt.err (!%p2564_p13)
}
  0x51   : > { %s2568_s22 = scalar_lea.vmem %s3193_s25, 16  ;;  %s2575_s0 = scalar_lea.vmem %s3193_s25, 32 }
  0x52   : > { %p2569_p0 = scmp.ne.s32.totalorder %s3193_s25, %s2568_s22  ;;  %p2576_p7 = scmp.lt.s32.totalorder %s3193_s25, %s3193_s25 }
  0x53   : > { %p2577_p9 = scmp.lt.s32.totalorder %s2575_s0, %s2568_s22 }
  0x54   : > { %p2571_p2 = pnand %p2569_p0, %p3205_p8 }
  0x55   : > { %p2578_p5 = por %p2577_p9, %p2576_p7 }
  0x56   : > { %p2572_p4 = pneg %p2571_p2 }
  0x58   : > { %p2579_p10 = pnand %p2578_p5, %p2572_p4 }
  0x5a   : > { %2582 = shalt.err (!%p2579_p10)
}
  0x5b   : > { %2362 = dma.hbm_to_vmem [thread:$0]  (!%p3189_p6), %s3946_s5, 16, %s3193_s25, [#allocation18]  }
  0x5c   : > { %s3947_s7 = sld [smem:[#allocation55_spill]] }
  0x62   : > { %s2583_s21 = scalar_lea.hbm %s3947_s7, 16 }
  0x63   : > { %p2584_p11 = scmp.ne.s32.totalorder %s3947_s7, %s2583_s21  ;;  %p2590_p0 = scmp.lt.u32.totalorder %s2583_s21, %s3947_s7 }
  0x65   : > { %p2586_p12 = pnand %p2584_p11, %p3205_p8 }
  0x67   : > { %p2587_p13 = pneg %p2586_p12 }
  0x69   : > { %p2592_p2 = pnand %p2590_p0, %p2587_p13 }
  0x6b   : > { %2595 = shalt.err (!%p2592_p2)
}
  0x6c   : > { %s2596_s0 = scalar_lea.vmem %s466_s27, 16  ;;  %s2603_s25 = scalar_lea.vmem %s466_s27, 32 }
  0x6d   : > { %p2597_p4 = scmp.ne.s32.totalorder %s466_s27, %s2596_s0  ;;  %p2604_p5 = scmp.lt.s32.totalorder %s466_s27, %s466_s27 }
  0x6e   : > { %p2605_p10 = scmp.lt.s32.totalorder %s2603_s25, %s2596_s0 }
  0x6f   : > { %p2599_p7 = pnand %p2597_p4, %p3205_p8 }
  0x70   : > { %p2606_p1 = por %p2605_p10, %p2604_p5 }
  0x71   : > { %p2600_p9 = pneg %p2599_p7 }
  0x73   : > { %p2607_p3 = pnand %p2606_p1, %p2600_p9 }
  0x75   : > { %2610 = shalt.err (!%p2607_p3)
}
  0x76   : > { %2368 = dma.hbm_to_vmem [thread:$0]  (!%p3189_p6), %s3947_s7, 16, %s466_s27, [#allocation21]  }
  0x77   : > { %s3048_s13 = smov [#allocation23]   ;;  %s3049_s21 = smov [#allocation26]  }
  0x78   : > { %s489_s28 = sshll.u32 %s3048_s13, 4  ;;  %s513_s24 = sshll.u32 %s3049_s21, 4  ;;  %s490_s28 = int_to_ptr.vmem [resolvable:$true] %s489_s28  ;;  %s514_s24 = int_to_ptr.vmem [resolvable:$true] %s513_s24 }
  0x79   : > { %s3948_s9 = sld [smem:[#allocation56_spill]] }
  0x7f   : > { %s2611_s22 = scalar_lea.hbm %s3948_s9, 16 }
  0x80   : > { %p2612_p1 = scmp.ne.s32.totalorder %s3948_s9, %s2611_s22  ;;  %p2618_p12 = scmp.lt.u32.totalorder %s2611_s22, %s3948_s9 }
  0x82   : > { %p2614_p3 = pnand %p2612_p1, %p3205_p8 }
  0x84   : > { %p2615_p11 = pneg %p2614_p3 }
  0x86   : > { %p2620_p13 = pnand %p2618_p12, %p2615_p11 }
  0x88   : > { %2623 = shalt.err (!%p2620_p13)
}
  0x89   : > { %s2624_s27 = scalar_lea.vmem %s490_s28, 16  ;;  %s2631_s12 = scalar_lea.vmem %s490_s28, 32 }
  0x8a   : > { %p2625_p0 = scmp.ne.s32.totalorder %s490_s28, %s2624_s27  ;;  %p2632_p7 = scmp.lt.s32.totalorder %s490_s28, %s490_s28 }
  0x8b   : > { %p2633_p9 = scmp.lt.s32.totalorder %s2631_s12, %s2624_s27 }
  0x8c   : > { %p2627_p2 = pnand %p2625_p0, %p3205_p8 }
  0x8d   : > { %p2634_p5 = por %p2633_p9, %p2632_p7 }
  0x8e   : > { %p2628_p4 = pneg %p2627_p2 }
  0x90   : > { %p2635_p10 = pnand %p2634_p5, %p2628_p4 }
  0x92   : > { %2638 = shalt.err (!%p2635_p10)
}
  0x93   : > { %2374 = dma.hbm_to_vmem [thread:$0]  (!%p3189_p6), %s3948_s9, 16, %s490_s28, [#allocation24]  }
  0x94   : > { %s3949_s11 = sld [smem:[#allocation57_spill]] }
  0x9a   : > { %s2639_s16 = scalar_lea.hbm %s3949_s11, 16 }
  0x9b   : > { %p2640_p1 = scmp.ne.s32.totalorder %s3949_s11, %s2639_s16  ;;  %p2646_p12 = scmp.lt.u32.totalorder %s2639_s16, %s3949_s11 }
  0x9d   : > { %p2642_p3 = pnand %p2640_p1, %p3205_p8 }
  0x9f   : > { %p2643_p11 = pneg %p2642_p3 }
  0xa1   : > { %p2648_p13 = pnand %p2646_p12, %p2643_p11 }
  0xa3   : > { %2651 = shalt.err (!%p2648_p13)
}
  0xa4   : > { %s2652_s27 = scalar_lea.vmem %s514_s24, 16  ;;  %s2659_s28 = scalar_lea.vmem %s514_s24, 32 }
  0xa5   : > { %p2653_p0 = scmp.ne.s32.totalorder %s514_s24, %s2652_s27  ;;  %p2660_p7 = scmp.lt.s32.totalorder %s514_s24, %s514_s24 }
  0xa6   : > { %p2661_p9 = scmp.lt.s32.totalorder %s2659_s28, %s2652_s27 }
  0xa7   : > { %p2655_p2 = pnand %p2653_p0, %p3205_p8 }
  0xa8   : > { %p2662_p5 = por %p2661_p9, %p2660_p7 }
  0xa9   : > { %p2656_p4 = pneg %p2655_p2 }
  0xab   : > { %p2663_p10 = pnand %p2662_p5, %p2656_p4 }
  0xad   : > { %2666 = shalt.err (!%p2663_p10)
}
  0xae   : > { %2380 = dma.hbm_to_vmem [thread:$0]  (!%p3189_p6), %s3949_s11, 16, %s514_s24, [#allocation27]  }
  0xaf   : > { %s2103_s21 = sadd.s32 4294967294, %s3041_s18   ;;  %s60_s20 = sadd.s32 1, %s3037_s17 }
  0xb0   : > { %s69_s26 = sadd.s32 1, %s3029_s15  ;;  %p62_p1 = scmp.ge.s32.totalorder %s60_s20, 2 }
  0xb1   : > { %p76_p3 = scmp.ne.s32.totalorder %s3029_s15, %s3025_s30  ;;  %p77_p11 = scmp.eq.s32.totalorder %s3041_s18, 0 }
  0xb2   : > { %p82_p12 = scmp.ne.s32.totalorder %s3025_s30, %s3021_s29  ;;  %s4005_s20 = smov (%p62_p1, %s60_s20), 0 }
  0xb3   : > { %3950 = sst [smem:[#allocation45_spill]] %s4005_s20  ;;  %p3318_p13 = por %p77_p11, %p76_p3 }
  0xb4   : > { %p3952_p0 = scmp.eq.s32.totalorder %s3173_s19, 0  ;;  %s64_s22 = ssub.s32 %s3037_s17, %s4005_s20 }
  0xb5   : > { %p402_p4 = scmp.eq.s32.totalorder %s3173_s19, 1  ;;  %p67_p7 = scmp.eq.s32.totalorder %s64_s22, 0 }
  0xb6   : > { %p3324_p2 = por %p3952_p0, %p82_p12  ;;  %p408_p9 = scmp.eq.s32.totalorder %s2103_s21, 1 }
  0xb7   : > { %p3331_p5 = por %p402_p4, %p76_p3  ;;  %p2414_p10 = scmp.lt.s32.totalorder %s3041_s18, 2 }
  0xb8   : > { %s3953_s24 = scalar_select %p3324_p2, 1, 0 }
  0xb9   : > { %s3954_s0 = scalar_select %p3331_p5, 1, 0 }
  0xba   : > { %s3337_s25 = scalar_select %p67_p7, %s3029_s15, %s69_s26  }
  0xbb   : > { %p3339_p1 = por %p408_p9, %p82_p12  ;;  %s3911_s27 = sand.u32 1, %s3029_s15  }
  0xbc   : > { %3955 = sst [smem:[#allocation46_spill]] %s3337_s25  ;;  %s3346_s28 = sshll.u32 %s3911_s27, 3 }
  0xbd   : > { %s3956_s2 = scalar_select %p3339_p1, 1, 0 }
  0xbe   : > { %s3349_s12 = sshll.u32 %s3037_s17, 7  ;;  %p3353_p3 = pnand %p2414_p10, %p3318_p13 }
  0xbf   : > { %3957 = sst [smem:[#allocation47_spill]] %s3956_s2  ;;  %s3913_s21 = sand.u32 1, %s3041_s18  }
  0xc0   : > { %s3958_s13 = scalar_select %p3353_p3, 1, 0 }
  0xc1   : > { %s3959_s1 = sld [smem:[#allocation49_spill]]  ;;  %s569_s27 = scalar_lea.vmem [#allocation11], %s3346_s28 }
  0xc2   : > { %s577_s4 = sshll.u32 %s569_s27, 4  ;;  %s3369_s16 = scalar_lea.sflag [#allocation12], %s3913_s21  ;;  %s3365_s4 = int_to_ptr.vmem [resolvable:$true] %s577_s4 }
  0xc3   : > { %p3375_p12 = pneg %p3353_p3 }
  0xc5   : > { %s3960_s7 = scalar_select %p3375_p12, 1, 0 }
  0xc7   : > { %s3362_s14 = scalar_lea.hbm %s3959_s1, %s3349_s12  ;;  %s2672_s27 = scalar_lea.hbm %s3959_s1, 256 }
  0xc8   : > { %s2667_s5 = scalar_lea.hbm %s3362_s14, 128  ;;  %p2673_p4 = scmp.lt.u32.totalorder %s3362_s14, %s3959_s1 }
  0xc9   : > { %p2668_p11 = scmp.ne.s32.totalorder %s3362_s14, %s2667_s5  ;;  %p2674_p7 = scmp.lt.u32.totalorder %s2672_s27, %s2667_s5 }
  0xca   : > { %p2676_p10 = scmp.lt.u32.totalorder %s2667_s5, %s3362_s14 }
  0xcb   : > { %p2670_p13 = pnand %p3375_p12, %p2668_p11  ;;  %p2675_p9 = por %p2674_p7, %p2673_p4 }
  0xcd   : > { %p2671_p0 = pneg %p2670_p13  ;;  %p2677_p1 = por %p2676_p10, %p2675_p9 }
  0xcf   : > { %p2678_p5 = pnand %p2677_p1, %p2671_p0 }
  0xd1   : > { %2681 = shalt.err (!%p2678_p5)
}
  0xd2   : > { %s2682_s21 = scalar_lea.vmem %s3365_s4, 128  ;;  %s3050_s26 = smov [#allocation11]  }
  0xd3   : > { %p2683_p11 = scmp.ne.s32.totalorder %s3365_s4, %s2682_s21  ;;  %s2687_s22 = sshll.u32 %s3050_s26, 4  ;;  %s2688_s22 = int_to_ptr.vmem [resolvable:$false] %s2687_s22 }
  0xd4   : > { %s2689_s9 = scalar_lea.vmem %s2688_s22, 256  ;;  %p2690_p6 = scmp.lt.s32.totalorder %s3365_s4, %s2688_s22 }
  0xd5   : > { %p2685_p13 = pnand %p2683_p11, %p3375_p12  ;;  %p2691_p8 = scmp.lt.s32.totalorder %s2689_s9, %s2682_s21 }
  0xd7   : > { %p2686_p2 = pneg %p2685_p13  ;;  %p2692_p4 = por %p2691_p8, %p2690_p6 }
  0xd9   : > { %p2693_p7 = pnand %p2692_p4, %p2686_p2 }
  0xdb   : > { %2696 = shalt.err (!%p2693_p7)
}
  0xdc   : > { %2393 = dma.hbm_to_vmem [thread:$0]  (!%p3353_p3), %s3362_s14, 128, %s3365_s4, %s3369_s16  }
  0xdd   : > { %s3051_s5 = smov [#allocation19]   ;;  %s3052_s27 = smov [#allocation22]  }
  0xde   : > { %s451_s11 = sshll.u32 %s3051_s5, 4  ;;  %s475_s1 = sshll.u32 %s3052_s27, 4  ;;  %s452_s11 = int_to_ptr.vmem [resolvable:$true] %s451_s11  ;;  %s476_s1 = int_to_ptr.vmem [resolvable:$true] %s475_s1 }
  0xdf   : > { %s3961_s6 = sld [smem:[#allocation54_spill]]  ;;  %p3962_p8 = scmp.ne.s32.totalorder %s3945_s3, 0 }
  0xe5   : > { %s2697_s22 = scalar_lea.hbm %s3961_s6, 256 }
  0xe6   : > { %p2698_p6 = scmp.ne.s32.totalorder %s3961_s6, %s2697_s22  ;;  %p2704_p1 = scmp.lt.u32.totalorder %s2697_s22, %s3961_s6 }
  0xe8   : > { %p2700_p2 = pnand %p2698_p6, %p3962_p8 }
  0xea   : > { %p2701_p5 = pneg %p2700_p2 }
  0xec   : > { %p2706_p0 = pnand %p2704_p1, %p2701_p5 }
  0xee   : > { %2709 = shalt.err (!%p2706_p0)
}
  0xef   : > { %s2710_s4 = scalar_lea.vmem %s452_s11, 256  ;;  %p2718_p13 = scmp.lt.s32.totalorder %s452_s11, %s452_s11 }
  0xf0   : > { %p2711_p9 = scmp.ne.s32.totalorder %s452_s11, %s2710_s4  ;;  %p2719_p4 = scmp.lt.s32.totalorder %s2710_s4, %s2710_s4 }
  0xf2   : > { %p2713_p10 = pnand %p2711_p9, %p3962_p8  ;;  %p2720_p7 = por %p2719_p4, %p2718_p13 }
  0xf4   : > { %p2714_p11 = pneg %p2713_p10 }
  0xf6   : > { %p2721_p3 = pnand %p2720_p7, %p2714_p11 }
  0xf8   : > { %2724 = shalt.err (!%p2721_p3)
}
  0xf9   : > { %p3963_p6 = scmp.ne.s32.totalorder %s3943_s23, 0  ;;  %s3964_s14 = smov 4  }
  0xfa   : > { %s3965_s20 = smov 64   ;;  %s2725_s26 = scalar_lea.hbm %s3891_s8, 256 }
  0xfb   : > { %2365 = dma.hbm_to_vmem [thread:$0]  (!%p3963_p6), %s3961_s6, 256, %s452_s11, [#allocation18], %s3965_s20, %s3965_s20, %s3964_s14  }
  0xfc   : > { %p2726_p2 = scmp.ne.s32.totalorder %s3891_s8, %s2725_s26  ;;  %p2732_p1 = scmp.lt.u32.totalorder %s2725_s26, %s3891_s8 }
  0xfe   : > { %p2728_p3 = pnand %p2726_p2, %p3962_p8 }
 0x100   : > { %p2729_p5 = pneg %p2728_p3 }
 0x102   : > { %p2734_p0 = pnand %p2732_p1, %p2729_p5 }
 0x104   : > { %2737 = shalt.err (!%p2734_p0)
}
 0x105   : > { %s2738_s17 = scalar_lea.vmem %s476_s1, 256  ;;  %p2746_p13 = scmp.lt.s32.totalorder %s476_s1, %s476_s1 }
 0x106   : > { %p2739_p9 = scmp.ne.s32.totalorder %s476_s1, %s2738_s17  ;;  %p2747_p4 = scmp.lt.s32.totalorder %s2738_s17, %s2738_s17 }
 0x108   : > { %p2741_p10 = pnand %p2739_p9, %p3962_p8  ;;  %p2748_p7 = por %p2747_p4, %p2746_p13 }
 0x10a   : > { %p2742_p11 = pneg %p2741_p10 }
 0x10c   : > { %p2749_p12 = pnand %p2748_p7, %p2742_p11 }
 0x10e   : > { %2752 = shalt.err (!%p2749_p12)
}
 0x10f   : > { %2371 = dma.hbm_to_vmem [thread:$0]  (!%p3963_p6), %s3891_s8, 256, %s476_s1, [#allocation21], %s3965_s20, %s3965_s20, %s3964_s14  }
 0x110   : > { %s3053_s5 = smov [#allocation25]   ;;  %s3054_s26 = smov [#allocation28]  }
 0x111   : > { %s499_s27 = sshll.u32 %s3053_s5, 4  ;;  %s524_s22 = sshll.u32 %s3054_s26, 4  ;;  %s500_s27 = int_to_ptr.vmem [resolvable:$true] %s499_s27  ;;  %s525_s22 = int_to_ptr.vmem [resolvable:$true] %s524_s22 }
 0x112   : > { %s2753_s4 = scalar_lea.hbm %s3893_s10, 256 }
 0x113   : > { %p2754_p12 = scmp.ne.s32.totalorder %s3893_s10, %s2753_s4  ;;  %p2760_p5 = scmp.lt.u32.totalorder %s2753_s4, %s3893_s10 }
 0x115   : > { %p2756_p2 = pnand %p2754_p12, %p3962_p8 }
 0x117   : > { %p2757_p3 = pneg %p2756_p2 }
 0x119   : > { %p2762_p1 = pnand %p2760_p5, %p2757_p3 }
 0x11b   : > { %2765 = shalt.err (!%p2762_p1)
}
 0x11c   : > { %s2766_s1 = scalar_lea.vmem %s500_s27, 256  ;;  %p2774_p11 = scmp.lt.s32.totalorder %s500_s27, %s500_s27 }
 0x11d   : > { %p2767_p0 = scmp.ne.s32.totalorder %s500_s27, %s2766_s1  ;;  %p2775_p13 = scmp.lt.s32.totalorder %s2766_s1, %s2766_s1 }
 0x11f   : > { %p2769_p9 = pnand %p2767_p0, %p3962_p8  ;;  %p2776_p4 = por %p2775_p13, %p2774_p11 }
 0x121   : > { %p2770_p10 = pneg %p2769_p9 }
 0x123   : > { %p2777_p7 = pnand %p2776_p4, %p2770_p10 }
 0x125   : > { %2780 = shalt.err (!%p2777_p7)
}
 0x126   : > { %2377 = dma.hbm_to_vmem [thread:$0]  (!%p3963_p6), %s3893_s10, 256, %s500_s27, [#allocation24], %s3965_s20, %s3965_s20, %s3964_s14  }
 0x127   : > { %s3966_s26 = sld [smem:[#allocation58_spill]] }
 0x12d   : > { %s2781_s21 = scalar_lea.hbm %s3966_s26, 16 }
 0x12e   : > { %p2782_p12 = scmp.ne.s32.totalorder %s3966_s26, %s2781_s21  ;;  %p2788_p5 = scmp.lt.u32.totalorder %s2781_s21, %s3966_s26 }
 0x130   : > { %p2784_p2 = pnand %p2782_p12, %p3962_p8 }
 0x132   : > { %p2785_p3 = pneg %p2784_p2 }
 0x134   : > { %p2790_p1 = pnand %p2788_p5, %p2785_p3 }
 0x136   : > { %2793 = shalt.err (!%p2790_p1)
}
 0x137   : > { %s2794_s1 = scalar_lea.vmem %s525_s22, 16  ;;  %s2801_s14 = scalar_lea.vmem %s525_s22, 32 }
 0x138   : > { %p2795_p0 = scmp.ne.s32.totalorder %s525_s22, %s2794_s1  ;;  %p2802_p11 = scmp.lt.s32.totalorder %s525_s22, %s525_s22 }
 0x139   : > { %p2803_p13 = scmp.lt.s32.totalorder %s2801_s14, %s2794_s1 }
 0x13a   : > { %p2797_p9 = pnand %p2795_p0, %p3962_p8 }
 0x13b   : > { %p2804_p4 = por %p2803_p13, %p2802_p11 }
 0x13c   : > { %p2798_p10 = pneg %p2797_p9 }
 0x13e   : > { %p2805_p7 = pnand %p2804_p4, %p2798_p10 }
 0x140   : > { %2808 = shalt.err (!%p2805_p7)
}
 0x141   : > { %2383 = dma.hbm_to_vmem [thread:$0]  (!%p3963_p6), %s3966_s26, 16, %s525_s22, [#allocation27]  }
 0x142   : > { %s3055_s6 = smov [#allocation29]   ;;  %s3967_s21 = sld [smem:[#allocation59_spill]] }
 0x143   : > { %s535_s2 = sshll.u32 %s3055_s6, 4  ;;  %s536_s2 = int_to_ptr.vmem [resolvable:$true] %s535_s2 }
 0x148   : > { %s2809_s9 = scalar_lea.hbm %s3967_s21, 16 }
 0x149   : > { %p2810_p12 = scmp.ne.s32.totalorder %s3967_s21, %s2809_s9  ;;  %p2816_p5 = scmp.lt.u32.totalorder %s2809_s9, %s3967_s21 }
 0x14b   : > { %p2812_p2 = pnand %p2810_p12, %p3962_p8 }
 0x14d   : > { %p2813_p3 = pneg %p2812_p2 }
 0x14f   : > { %p2818_p1 = pnand %p2816_p5, %p2813_p3 }
 0x151   : > { %2821 = shalt.err (!%p2818_p1)
}
 0x152   : > { %s2822_s22 = scalar_lea.vmem %s536_s2, 16  ;;  %s2829_s14 = scalar_lea.vmem %s536_s2, 32 }
 0x153   : > { %p2823_p0 = scmp.ne.s32.totalorder %s536_s2, %s2822_s22  ;;  %p2830_p11 = scmp.lt.s32.totalorder %s536_s2, %s536_s2 }
 0x154   : > { %p2831_p13 = scmp.lt.s32.totalorder %s2829_s14, %s2822_s22 }
 0x155   : > { %p2825_p9 = pnand %p2823_p0, %p3962_p8 }
 0x156   : > { %p2832_p4 = por %p2831_p13, %p2830_p11 }
 0x157   : > { %p2826_p10 = pneg %p2825_p9 }
 0x159   : > { %p2833_p7 = pnand %p2832_p4, %p2826_p10 }
 0x15b   : > { %2836 = shalt.err (!%p2833_p7)
}
 0x15c   : > { %2386 = dma.hbm_to_vmem [thread:$0]  (!%p3963_p6), %s3967_s21, 16, %s536_s2, [#allocation30]  }
 0x15d   : > { %s3968_s25 = sld [smem:[#allocation48_spill]]  ;;  %s550_s9 = scalar_lea.vmem [#allocation8], %s3346_s28 }
 0x15e   : > { %s558_s4 = sshll.u32 %s550_s9, 4  ;;  %s3969_s23 = sand.u32 1, %s3029_s15   ;;  %s559_s4 = int_to_ptr.vmem [resolvable:$true] %s558_s4 }
 0x15f   : > { %s547_s17 = scalar_lea.sflag [#allocation9], %s3969_s23  ;;  %p3970_p12 = scmp.ne.s32.totalorder %s3960_s7, 0 }
 0x163   : > { %s3502_s5 = scalar_lea.hbm %s3968_s25, %s3349_s12  ;;  %s2842_s22 = scalar_lea.hbm %s3968_s25, 256 }
 0x164   : > { %s2837_s11 = scalar_lea.hbm %s3502_s5, 128  ;;  %p2843_p6 = scmp.lt.u32.totalorder %s3502_s5, %s3968_s25 }
 0x165   : > { %p2838_p8 = scmp.ne.s32.totalorder %s3502_s5, %s2837_s11  ;;  %p2844_p5 = scmp.lt.u32.totalorder %s2842_s22, %s2837_s11 }
 0x166   : > { %p2846_p0 = scmp.lt.u32.totalorder %s2837_s11, %s3502_s5 }
 0x167   : > { %p2840_p2 = pnand %p2838_p8, %p3970_p12  ;;  %p2845_p1 = por %p2844_p5, %p2843_p6 }
 0x169   : > { %p2841_p3 = pneg %p2840_p2  ;;  %p2847_p9 = por %p2846_p0, %p2845_p1 }
 0x16b   : > { %p2848_p10 = pnand %p2847_p9, %p2841_p3 }
 0x16d   : > { %2851 = shalt.err (!%p2848_p10)
}
 0x16e   : > { %s2852_s27 = scalar_lea.vmem %s559_s4, 128  ;;  %s3056_s6 = smov [#allocation8]  }
 0x16f   : > { %p2853_p11 = scmp.ne.s32.totalorder %s559_s4, %s2852_s27  ;;  %s2857_s3 = sshll.u32 %s3056_s6, 4  ;;  %s2858_s3 = int_to_ptr.vmem [resolvable:$false] %s2857_s3 }
 0x170   : > { %s2859_s9 = scalar_lea.vmem %s2858_s3, 256  ;;  %p2860_p7 = scmp.lt.s32.totalorder %s559_s4, %s2858_s3 }
 0x171   : > { %p2855_p13 = pnand %p2853_p11, %p3970_p12  ;;  %p2861_p8 = scmp.lt.s32.totalorder %s2859_s9, %s2852_s27 }
 0x173   : > { %p2856_p4 = pneg %p2855_p13  ;;  %p2862_p2 = por %p2861_p8, %p2860_p7 }
 0x175   : > { %p2863_p5 = pnand %p2862_p2, %p2856_p4 }
 0x177   : > { %2866 = shalt.err (!%p2863_p5)
}
 0x178   : > { %p3971_p6 = scmp.ne.s32.totalorder %s3958_s13, 0  ;;  %s3972_s2 = sld [smem:[#allocation50_spill]] }
 0x179   : > { %s588_s22 = scalar_lea.vmem [#allocation13], %s3346_s28 }
 0x17a   : > { %2390 = dma.hbm_to_vmem [thread:$0]  (!%p3971_p6), %s3502_s5, 128, %s559_s4, %s547_s17  }
 0x17b   : > { %s596_s14 = sshll.u32 %s588_s22, 4  ;;  %s597_s14 = int_to_ptr.vmem [resolvable:$true] %s596_s14 }
 0x17e   : > { %s3528_s1 = scalar_lea.hbm %s3972_s2, %s3349_s12  ;;  %s2872_s5 = scalar_lea.hbm %s3972_s2, 256 }
 0x17f   : > { %s2867_s20 = scalar_lea.hbm %s3528_s1, 128  ;;  %p2873_p9 = scmp.lt.u32.totalorder %s3528_s1, %s3972_s2 }
 0x180   : > { %p2868_p3 = scmp.ne.s32.totalorder %s3528_s1, %s2867_s20  ;;  %p2874_p10 = scmp.lt.u32.totalorder %s2872_s5, %s2867_s20 }
 0x181   : > { %p2876_p13 = scmp.lt.u32.totalorder %s2867_s20, %s3528_s1 }
 0x182   : > { %p2870_p1 = pnand %p2868_p3, %p3970_p12  ;;  %p2875_p11 = por %p2874_p10, %p2873_p9 }
 0x184   : > { %p2871_p0 = pneg %p2870_p1  ;;  %p2877_p4 = por %p2876_p13, %p2875_p11 }
 0x186   : > { %p2878_p7 = pnand %p2877_p4, %p2871_p0 }
 0x188   : > { %2881 = shalt.err (!%p2878_p7)
}
 0x189   : > { %s2882_s3 = scalar_lea.vmem %s597_s14, 128  ;;  %s3057_s9 = smov [#allocation13]  }
 0x18a   : > { %p2883_p8 = scmp.ne.s32.totalorder %s597_s14, %s2882_s3  ;;  %s2887_s23 = sshll.u32 %s3057_s9, 4  ;;  %s2888_s23 = int_to_ptr.vmem [resolvable:$false] %s2887_s23 }
 0x18b   : > { %s2889_s11 = scalar_lea.vmem %s2888_s23, 256  ;;  %p2890_p3 = scmp.lt.s32.totalorder %s597_s14, %s2888_s23 }
 0x18c   : > { %p2885_p2 = pnand %p2883_p8, %p3970_p12  ;;  %p2891_p1 = scmp.lt.s32.totalorder %s2889_s11, %s2882_s3 }
 0x18e   : > { %p2886_p5 = pneg %p2885_p2  ;;  %p2892_p6 = por %p2891_p1, %p2890_p3 }
 0x190   : > { %p2893_p9 = pnand %p2892_p6, %p2886_p5 }
 0x192   : > { %2896 = shalt.err (!%p2893_p9)
}
 0x193   : > { %p3973_p10 = scmp.ne.s32.totalorder %s3958_s13, 0  ;;  %s3974_s27 = sld [smem:[#allocation51_spill]] }
 0x194   : > { %s607_s5 = scalar_lea.vmem [#allocation14], %s3346_s28  ;;  %s3975_s17 = sand.u32 1, %s3041_s18  }
 0x195   : > { %2396 = dma.hbm_to_vmem [thread:$0]  (!%p3973_p10), %s3528_s1, 128, %s597_s14, %s3369_s16  }
 0x196   : > { %s615_s4 = sshll.u32 %s607_s5, 4  ;;  %s604_s3 = scalar_lea.sflag [#allocation15], %s3975_s17  ;;  %s616_s4 = int_to_ptr.vmem [resolvable:$true] %s615_s4 }
 0x199   : > { %s3553_s6 = scalar_lea.hbm %s3974_s27, %s3349_s12  ;;  %s2902_s14 = scalar_lea.hbm %s3974_s27, 256 }
 0x19a   : > { %s2897_s9 = scalar_lea.hbm %s3553_s6, 128  ;;  %p2903_p13 = scmp.lt.u32.totalorder %s3553_s6, %s3974_s27 }
 0x19b   : > { %p2898_p6 = scmp.ne.s32.totalorder %s3553_s6, %s2897_s9  ;;  %p2904_p4 = scmp.lt.u32.totalorder %s2902_s14, %s2897_s9 }
 0x19c   : > { %p2906_p8 = scmp.lt.u32.totalorder %s2897_s9, %s3553_s6 }
 0x19d   : > { %p2900_p0 = pnand %p2898_p6, %p3970_p12  ;;  %p2905_p7 = por %p2904_p4, %p2903_p13 }
 0x19f   : > { %p2901_p11 = pneg %p2900_p0  ;;  %p2907_p2 = por %p2906_p8, %p2905_p7 }
 0x1a1   : > { %p2908_p5 = pnand %p2907_p2, %p2901_p11 }
 0x1a3   : > { %2911 = shalt.err (!%p2908_p5)
}
 0x1a4   : > { %s2912_s28 = scalar_lea.vmem %s616_s4, 128  ;;  %s3058_s11 = smov [#allocation14]  }
 0x1a5   : > { %p2913_p3 = scmp.ne.s32.totalorder %s616_s4, %s2912_s28  ;;  %s2917_s22 = sshll.u32 %s3058_s11, 4  ;;  %s2918_s22 = int_to_ptr.vmem [resolvable:$false] %s2917_s22 }
 0x1a6   : > { %s2919_s20 = scalar_lea.vmem %s2918_s22, 256  ;;  %p2920_p6 = scmp.lt.s32.totalorder %s616_s4, %s2918_s22 }
 0x1a7   : > { %p2915_p1 = pnand %p2913_p3, %p3970_p12  ;;  %p2921_p0 = scmp.lt.s32.totalorder %s2919_s20, %s2912_s28 }
 0x1a9   : > { %p2916_p9 = pneg %p2915_p1  ;;  %p2922_p10 = por %p2921_p0, %p2920_p6 }
 0x1ab   : > { %p2923_p4 = pnand %p2922_p10, %p2916_p9 }
 0x1ad   : > { %2926 = shalt.err (!%p2923_p4)
}
 0x1ae   : > { %p3976_p13 = scmp.ne.s32.totalorder %s3958_s13, 0  ;;  %s3977_s5 = sld [smem:[#allocation44_spill]] }
 0x1b0   : > { %2399 = dma.hbm_to_vmem [thread:$0]  (!%p3976_p13), %s3553_s6, 128, %s616_s4, %s604_s3  }
 0x1b4   : > { %p3978_p11 = scmp.ne.s32.totalorder %s3977_s5, 0 }
 0x1b5   : > { %s3578_s7 = sand.u32 (!%p3978_p11), 1, %s3025_s30   ;;  %p3979_p12 = scmp.ne.s32.totalorder (!%p3978_p11), %s3953_s24, 0 }
 0x1b6   : > { %624 = sbr.rel (%p3978_p11) target bundleno = 2183 (0x887), region = 76  ;;  %s3581_s17 = sshll.u32 (!%p3978_p11), %s3578_s7, 3 }
 0x1b7   : > { %s627_s9 = scalar_lea.sflag (!%p3978_p11), [#allocation9], %s3578_s7  ;;  %s630_s16 = scalar_lea.vmem (!%p3978_p11), [#allocation8], %s3581_s17 }
 0x1bd   : > { %2980 = dma.done.wait (%p3979_p12), %s627_s9, 128  }
 0x1be   : > { %2982 = vsyncadd (%p3979_p12), %s627_s9, 4294967168  ;;  %s635_s13 = sand.u32 1, %s3173_s19   ;;  %s639_s4 = scalar_lea.vmem [#allocation11], %s3581_s17 }
 0x1bf   : > { %s636_s6 = scalar_lea.sflag [#allocation12], %s635_s13 }
 0x1c0   : > { %2984 = dma.done.wait (%p3979_p12), %s636_s6, 256  }
 0x1c1   : > { %2986 = vsyncadd (%p3979_p12), %s636_s6, 4294967040  ;;  %s648_s3 = scalar_lea.vmem [#allocation13], %s3581_s17  ;;  %s654_s1 = scalar_lea.sflag [#allocation15], %s635_s13 }
 0x1c2   : > { %s657_s14 = scalar_lea.vmem [#allocation14], %s3581_s17 }
 0x1c3   : > { %2988 = dma.done.wait (%p3979_p12), %s654_s1, 128  }
 0x1c4   : > { %2990 = vsyncadd (%p3979_p12), %s654_s1, 4294967168  ;;  %p3980_p10 = scmp.eq.s32.totalorder %s3173_s19, 0 }
 0x1c6   : > { %2992 = dma.done.wait (%p3980_p10), [#allocation15], 256   ;;  %p3981_p7 = pmov %p3980_p10 }
 0x1c8   : > { %2994 = vsyncadd (%p3981_p7), [#allocation15], 4294967040  ;;  %p3982_p8 = pmov %p3981_p7 }
 0x1c9   : > { %p3983_p2 = pmov %p3981_p7 }
 0x1ca   : > { %2996 = dma.done.wait (%p3982_p8), [#allocation18], 272  }
 0x1cb   : > { %2998 = vsyncadd (%p3983_p2), [#allocation18], 4294967024  ;;  %p3984_p5 = pmov %p3983_p2 }
 0x1cc   : > { %p3985_p3 = pmov %p3983_p2 }
 0x1cd   : > { %3000 = dma.done.wait (%p3984_p5), [#allocation21], 272  }
 0x1ce   : > { %3002 = vsyncadd (%p3985_p3), [#allocation21], 4294967024  ;;  %p3986_p1 = pmov %p3983_p2 }
 0x1d0   : > { %3004 = dma.done.wait (%p3986_p1), [#allocation24], 272   ;;  %p3987_p9 = pmov %p3986_p1 }
 0x1d1   : > { %p3988_p6 = pmov %p3986_p1 }
 0x1d2   : > { %3006 = vsyncadd (%p3987_p9), [#allocation24], 4294967024 }
 0x1d3   : > { %3008 = dma.done.wait (%p3988_p6), [#allocation27], 32   ;;  %p3989_p0 = pmov %p3986_p1 }
 0x1d5   : > { %3010 = vsyncadd (%p3989_p0), [#allocation27], 4294967264  ;;  %p3990_p4 = pmov %p3989_p0 }
 0x1d6   : > { %p3991_p13 = pmov %p3989_p0 }
 0x1d7   : > { %3012 = dma.done.wait (%p3990_p4), [#allocation30], 16  }
 0x1d8   : > { %3014 = vsyncadd (%p3991_p13), [#allocation30], 4294967280  ;;  %v3059_v0 = vmov 0.0   ;;  %vm3060_vm0 = vmmov 0   ;;  %v2495_v1 = vld [vmem:[#allocation19] sm:$0xff]   ;;  %v2496_v2 = vld [vmem:[#allocation16] sm:$0xff]  }
 0x1d9   : > { %2218 = vmatprep.subr.bf16.mxu1 %v3059_v0  ;;  %2210 = vmatprep.subr.bf16.mxu0 %v3059_v0  ;;  %v2497_v3 = vld [vmem:[#allocation19 + $0x8] sm:$0xff]   ;;  %v2498_v5 = vld [vmem:[#allocation16 + $0x8] sm:$0xff]   ;;  %vm787_vm1 = vcmask 261120   ;;  %vm861_vm2 = vcmask 64512   ;;  %v2145_v13 = vld [vmem:[#allocation20] ss:$0 sm:$0xff] }
 0x1da   : > { %2222 = vmatprep.mubr.msk.bf16.mxu1 %vm3060_vm0, %v3059_v0  ;;  %2214 = vmatprep.mubr.msk.bf16.mxu0 %vm3060_vm0, %v3059_v0  ;;  %v866_v4 = vld [vmem:[%s639_s4] sm:$0xff]  ;;  %v762_v6 = vld [vmem:[%s630_s16] sm:$0xff]  ;;  %862 = vst.msk [vmem:[#allocation7] sm:$0xff] %vm861_vm2, %v3059_v0  ;;  %863 = vst.msk [vmem:[#allocation7 + $0x8] sm:$0xff] %vm861_vm2, %v3059_v0  ;;  %vm832_vm3 = vcmask 60416   ;;  %s3061_s19 = smov 112  }
 0x1db   : > { %2219 = vmatpush3.bf16.msra.mxu1 %v2495_v1  ;;  %2211 = vmatpush3.bf16.msra.mxu0 %v2496_v2  ;;  %v867_v7 = vpack.c.bf16 %v866_v4, %v866_v4  ;;  %v763_v8 = vpack.c.bf16 %v762_v6, %v762_v6  ;;  %864 = vst.msk [vmem:[#allocation7 + $0x10] sm:$0xff] %vm861_vm2, %v3059_v0  ;;  %865 = vst.msk [vmem:[#allocation7 + $0x18] sm:$0xff] %vm861_vm2, %v3059_v0  ;;  %v2499_v9 = vld [vmem:[#allocation22] sm:$0xff]   ;;  %v2500_v10 = vld [vmem:[#allocation22 + $0x8] sm:$0xff]   ;;  %s3062_s24 = smov 120   ;;  %s3063_s12 = smov 104  }
 0x1dc   : > { %2220 = vmatprep.subr.bf16.mxu1 %v3059_v0  ;;  %2212 = vmatprep.subr.bf16.mxu0 %v3059_v0  ;;  %v868_v11 = vld [vmem:[%s648_s3] sm:$0xff]  ;;  %v2140_v14 = vld [vmem:[#allocation17] ss:$0 sm:$0xff]  ;;  %v2149_v45 = vld [vmem:[#allocation23] ss:$0 sm:$0xff]  ;;  %vm1369_vm4 = vcmask 1043456  }
 0x1dd   : > { %v869_v12 = vpack.c.bf16 %v868_v11, %v868_v11  ;;  %vm852_vm5 = vcmask 7168   ;;  %v3064_v54 = vmov -inf   ;;  %v3065_v60 = vmov 0   ;;  %s3992_s23 = sld [smem:[#allocation42_spill]]  ;;  %s756_s11 = scalar_lea.vmem [#allocation31], %s3581_s17 }
 0x1de   : > { %853 = vst.msk [vmem:[#allocation5] sm:$0xff] %vm852_vm5, %v3064_v54  ;;  %854 = vst.msk [vmem:[#allocation5 + $0x8] sm:$0xff] %vm852_vm5, %v3064_v54  ;;  %2493 = vset.pattern.permute.xlu1 %v3065_v60  ;;  %2494 = vset.pattern.permute.xlu0 %v3065_v60  ;;  %s1855_s22 = sshll.u32 %s756_s11, 4  ;;  %s3993_s9 = sld [smem:[#allocation60_spill]]  ;;  %s3835_s22 = int_to_ptr.vmem [resolvable:$true] %s1855_s22 }
 0x1df   : > { %2221 = vmatpush3.bf16.msra.mxu1 %v2497_v3  ;;  %2213 = vmatpush3.bf16.msra.mxu0 %v2498_v5  ;;  %855 = vst.msk [vmem:[#allocation5 + $0x10] sm:$0xff] %vm852_vm5, %v3064_v54  ;;  %856 = vst.msk [vmem:[#allocation5 + $0x18] sm:$0xff] %vm852_vm5, %v3064_v54  ;;  %s1841_s13 = scalar_lea.sflag [#allocation10], %s3578_s7  ;;  %s2927_s6 = scalar_lea.vmem %s3835_s22, 128 }
 0x1e0   : > { %2234 = vmatprep.subr.bf16.mxu1 %v3059_v0  ;;  %2226 = vmatprep.subr.bf16.mxu0 %v3059_v0  ;;  %857 = vst.msk [vmem:[#allocation6] sm:$0xff] %vm852_vm5, %v3059_v0  ;;  %858 = vst.msk [vmem:[#allocation6 + $0x8] sm:$0xff] %vm852_vm5, %v3059_v0  ;;  %p2928_p11 = scmp.ne.s32.totalorder %s3835_s22, %s2927_s6  ;;  %p3994_p12 = scmp.ne.s32.totalorder %s3954_s0, 0 }
 0x1e1   : > { %859 = vst.msk [vmem:[#allocation6 + $0x10] sm:$0xff] %vm852_vm5, %v3059_v0  ;;  %860 = vst.msk [vmem:[#allocation6 + $0x18] sm:$0xff] %vm852_vm5, %v3059_v0  ;;  %s3066_s17 = smov [#allocation31]  }
 0x1e2   : > { %2223 = vmatmul.mubr.msk.bf16.vlgmr.msra.gmra.mrb[0].mxu1 %vm787_vm1, %v867_v7  ;;  %2215 = vmatmul.mubr.msk.bf16.vlgmr.msra.gmra.mrb[0].mxu0 %vm787_vm1, %v763_v8  ;;  %p2929_p10 = pnand %p2928_p11, %p3994_p12  ;;  %s2931_s4 = sshll.u32 %s3066_s17, 4  ;;  %s2932_s4 = int_to_ptr.vmem [resolvable:$false] %s2931_s4 }
 0x1e3   : > { %2236 = vmatprep.mubr.msk.bf16.mxu1 %vm3060_vm0, %v3059_v0  ;;  %2230 = vmatprep.mubr.msk.bf16.mxu0 %vm3060_vm0, %v3059_v0  ;;  %s2171_s28 = sshll.u32 %s3992_s23, 7  ;;  %s2933_s3 = scalar_lea.vmem %s2932_s4, 256 }
 0x1e4   : > { %2227 = vmatpush3.bf16.msra.mxu0 %v2499_v9  ;;  %s3833_s16 = scalar_lea.hbm %s3993_s9, %s2171_s28  ;;  %p2930_p7 = pneg %p2929_p10 }
 0x1e5   : > { %2228 = vmatprep.subr.bf16.mxu0 %v3059_v0  ;;  %p2934_p8 = scmp.lt.s32.totalorder %s3835_s22, %s2932_s4  ;;  %p2935_p2 = scmp.lt.s32.totalorder %s2933_s3, %s2927_s6 }
 0x1e7   : > { %p2936_p5 = por %p2935_p2, %p2934_p8 }
 0x1e8   : > { %2229 = vmatpush3.bf16.msra.mxu0 %v2500_v10 }
 0x1e9   : > { %2240 = vmatprep.subr.bf16.mxu0 %v3059_v0  ;;  %p2937_p3 = pnand %p2936_p5, %p2930_p7 }
 0x1eb   : > { %2231 = vmatmul.mubr.msk.bf16.vlgmr.msra.gmra.mrb[4].mxu0 %vm787_vm1, %v869_v12 }
 0x1ec   : > { %2242 = vmatprep.mubr.msk.bf16.mxu0 %vm3060_vm0, %v3059_v0 }
 0x2b5   : > { %v931_v15 = vpop.f32.mrb[0].mxu1  ;;  %v825_v18 = vpop.f32.mrb[0].mxu0 }
 0x2b6   : > { %v932_v16 = vadd.f32 %v2145_v13, %v931_v15  ;;  %v2224_v17 = vpop.f32.mrb[1].mxu1  ;;  %v826_v20 = vadd.f32 %v2140_v14, %v825_v18  ;;  %v2216_v21 = vpop.f32.mrb[1].mxu0  ;;  %v3722_v13 = vld [vmem:[#allocation5] sm:$0xff]  ;;  %v1238_v18 = vld [vmem:[#allocation5 + $0x8] sm:$0xff] }
 0x2b7   : > { %v934_v19 = vpop.f32.mrb[2].mxu1  ;;  %v828_v24 = vpop.f32.mrb[2].mxu0  ;;  %v3732_v17 = vld [vmem:[#allocation5 + $0x10] sm:$0xff] }
 0x2b8   : > { %v937_v22 = vpack.c.bf16 %v932_v16, %v932_v16  ;;  %v2225_v23 = vpop.f32.mrb[3].mxu1  ;;  %v831_v25 = vpack.c.bf16 %v826_v20, %v826_v20  ;;  %v2217_v26 = vpop.f32.mrb[3].mxu0  ;;  %v3743_v24 = vld [vmem:[#allocation5 + $0x18] sm:$0xff] }
 0x2ba   : > { %1006 = vst.msk [vmem:[#allocation3] sm:$0xf] %vm832_vm3, %v937_v22  ;;  %1024 = vrot.lane.b32.xlu1 %v937_v22, %s3061_s19  ;;  %1011 = vrot.lane.b32.xlu0 %v937_v22, %s3062_s24  ;;  %833 = vst.msk [vmem:[#allocation2] sm:$0xf] %vm832_vm3, %v831_v25 }
 0x2be   : > { %1034 = vrot.lane.b32.xlu1 %v937_v22, %s3063_s12  ;;  %837 = vrot.lane.b32.xlu0 %v831_v25, %s3062_s24  ;;  %v998_v46 = vpop.f32.mrb[4].mxu0 }
 0x2bf   : > { %v999_v47 = vadd.f32 %v2149_v45, %v998_v46  ;;  %v2232_v48 = vpop.f32.mrb[5].mxu0 }
 0x2c0   : > { %v1001_v49 = vpop.f32.mrb[6].mxu0 }
 0x2c1   : > { %v1048_v27 = vld [vmem:[#allocation3] sm:$0xf]  ;;  %v1044_v29 = vld [vmem:[#allocation2] sm:$0xf]  ;;  %v3694_v50 = vpack.c.bf16 %v999_v47, %v999_v47  ;;  %v2233_v51 = vpop.f32.mrb[7].mxu0 }
 0x2c2   : > { %842 = vrot.lane.b32.xlu0 %v831_v25, %s3061_s19  ;;  %v1057_v28 = vsel %vm861_vm2, %v1048_v27, 0  ;;  %847 = vrot.lane.b32.xlu1 %v831_v25, %s3063_s12 }
 0x2c3   : > { %2235 = vmatpush3.bf16.xpose.msra.mxu1 %v1057_v28  ;;  %1007 = vst.msk [vmem:[#allocation4] sm:$0xf] %vm832_vm3, %v3694_v50 }
 0x2c4   : > { %2246 = vmatprep.subr.bf16.mxu1 %v3059_v0 }
 0x2ca   : > { %2237 = vmatmul.mubr.msk.bf16.vlgmr.msra.gmra.mrb[4].mxu1 %vm861_vm2, %v1044_v29  ;;  %v1362_v52 = vld [vmem:[#allocation4] sm:$0xf] }
 0x2cb   : > { %2248 = vmatprep.mubr.msk.bf16.mxu1 %vm3060_vm0, %v3059_v0  ;;  %v1371_v53 = vsel %vm1369_vm4, %v1362_v52, 0 }
 0x32c   : > { %v1025_v30 = vpop.permute.xlu1 %1024  ;;  %v1012_v31 = vpop.permute.xlu0 %1011 }
 0x32d   : > { %1028 = vst.msk [vmem:[#allocation3 + $0x8] sm:$0xf] %vm832_vm3, %v1025_v30  ;;  %1015 = vst.msk [vmem:[#allocation3 + $0x4] sm:$0xf] %vm832_vm3, %v1012_v31 }
 0x330   : > { %v1035_v32 = vpop.permute.xlu1 %1034  ;;  %v838_v33 = vpop.permute.xlu0 %837 }
 0x331   : > { %1038 = vst.msk [vmem:[#allocation3 + $0xc] sm:$0xf] %vm832_vm3, %v1035_v32  ;;  %841 = vst.msk [vmem:[#allocation2 + $0x4] sm:$0xf] %vm832_vm3, %v838_v33 }
 0x334   : > { %v843_v34 = vpop.permute.xlu0 %842  ;;  %v848_v35 = vpop.permute.xlu1 %847  ;;  %v1049_v36 = vld [vmem:[#allocation3 + $0x4] sm:$0xf]  ;;  %v1050_v37 = vld [vmem:[#allocation3 + $0x8] sm:$0xf] }
 0x335   : > { %846 = vst.msk [vmem:[#allocation2 + $0x8] sm:$0xf] %vm832_vm3, %v843_v34  ;;  %851 = vst.msk [vmem:[#allocation2 + $0xc] sm:$0xf] %vm832_vm3, %v848_v35  ;;  %v1103_v38 = vsel %vm861_vm2, %v1049_v36, 0  ;;  %v1149_v39 = vsel %vm861_vm2, %v1050_v37, 0 }
 0x336   : > { %2241 = vmatpush3.bf16.xpose.msra.mxu0 %v1103_v38  ;;  %2247 = vmatpush3.bf16.xpose.msra.mxu1 %v1149_v39 }
 0x337   : > { %2252 = vmatprep.subr.bf16.mxu0 %v3059_v0  ;;  %2258 = vmatprep.subr.bf16.mxu1 %v3059_v0 }
 0x338   : > { %v1045_v40 = vld [vmem:[#allocation2 + $0x4] sm:$0xf]  ;;  %v1051_v41 = vld [vmem:[#allocation3 + $0xc] sm:$0xf] }
 0x339   : > { %v1195_v43 = vsel %vm861_vm2, %v1051_v41, 0 }
 0x33c   : > { %v1046_v42 = vld [vmem:[#allocation2 + $0x8] sm:$0xf]  ;;  %v1047_v44 = vld [vmem:[#allocation2 + $0xc] sm:$0xf] }
 0x33d   : > { %2243 = vmatmul.mubr.msk.bf16.vlgmr.msra.gmra.mrb[8].mxu0 %vm861_vm2, %v1045_v40  ;;  %2249 = vmatmul.mubr.msk.bf16.vlgmr.msra.gmra.mrb[8].mxu1 %vm861_vm2, %v1046_v42 }
 0x33e   : > { %2253 = vmatpush3.bf16.xpose.msra.mxu0 %v1195_v43  ;;  %2254 = vmatprep.mubr.msk.bf16.mxu0 %vm3060_vm0, %v3059_v0 }
 0x33f   : > { %2260 = vmatprep.mubr.msk.bf16.mxu1 %vm3060_vm0, %v3059_v0  ;;  %2264 = vmatprep.subr.bf16.mxu0 %v3059_v0 }
 0x340   : > { %2259 = vmatpush3.bf16.msra.mxu1 %v1371_v53 }
 0x341   : > { %2270 = vmatprep.subr.bf16.mxu1 %v3059_v0 }
 0x345   : > { %2255 = vmatmul.mubr.msk.bf16.vlgmr.msra.gmra.mrb[12].mxu0 %vm861_vm2, %v1047_v44 }
 0x346   : > { %2266 = vmatprep.mubr.msk.bf16.mxu0 %vm3060_vm0, %v3059_v0 }
 0x39d   : > { %v1093_v55 = vpop.f32.mrb[4].mxu1 }
 0x39e   : > { %v2238_v56 = vpop.f32.mrb[5].mxu1  ;;  %v1241_v57 = vsel %vm861_vm2, %v1093_v55, -inf }
 0x39f   : > { %1242 = vmax.xlane.f32.xlu0 %v1241_v57  ;;  %v1096_v58 = vpop.f32.mrb[6].mxu1 }
 0x3a0   : > { %v2239_v59 = vpop.f32.mrb[7].mxu1 }
 0x410   : > { %v3713_v61 = vpop.f32.mrb[8].mxu0  ;;  %v3715_v62 = vpop.f32.mrb[8].mxu1 }
 0x411   : > { %v2244_v63 = vpop.f32.mrb[9].mxu0  ;;  %v2250_v1 = vpop.f32.mrb[9].mxu1  ;;  %v1247_v2 = vsel %vm861_vm2, %v3715_v62, -inf  ;;  %v1244_v3 = vsel %vm861_vm2, %v3713_v61, -inf }
 0x412   : > { %1248 = vmax.xlane.f32.xlu0 %v1247_v2  ;;  %v1188_v4 = vpop.f32.mrb[10].mxu1  ;;  %1245 = vmax.xlane.f32.xlu1 %v1244_v3  ;;  %v1142_v5 = vpop.f32.mrb[10].mxu0  ;;  %v1301_v3 = vld [vmem:[#allocation6] sm:$0xff] }
 0x413   : > { %v2245_v6 = vpop.f32.mrb[11].mxu0  ;;  %v2251_v7 = vpop.f32.mrb[11].mxu1 }
 0x418   : > { %v1231_v8 = vpop.f32.mrb[12].mxu0 }
 0x419   : > { %v2256_v9 = vpop.f32.mrb[13].mxu0  ;;  %v1250_v10 = vsel %vm861_vm2, %v1231_v8, -inf }
 0x41a   : > { %1251 = vmax.xlane.f32.xlu0 %v1250_v10  ;;  %v1234_v11 = vpop.f32.mrb[14].mxu0 }
 0x41b   : > { %v2257_v12 = vpop.f32.mrb[15].mxu0 }
 0x42c   : > { %v1243_v14 = vpop.xlane.xlu0 %1242 }
 0x42d   : > { %v3725_v15 = vmax.f32 %v3722_v13, %v1243_v14  ;;  %v1302_v14 = vld [vmem:[#allocation6 + $0x8] sm:$0xff] }
 0x42f   : > { %v1257_v16 = vsub.f32 %v3722_v13, %v3725_v15  ;;  %1559 = vst.msk [vmem:[#allocation5] sm:$0xff] %vm852_vm5, %v3725_v15  ;;  %1271 = vperm.xlu1 %2493, %v3725_v15  }
 0x431   : > { %v1261_v60 = vmul.f32 1.442695, %v1257_v16 }
 0x49f   : > { %v1249_v19 = vpop.xlane.xlu0 %1248  ;;  %v1246_v20 = vpop.xlane.xlu1 %1245 }
 0x4a0   : > { %v3735_v21 = vmax.f32 %v3732_v17, %v1249_v19  ;;  %v1254_v22 = vmax.f32 %v1238_v18, %v1246_v20  ;;  %v1303_v19 = vld [vmem:[#allocation6 + $0x10] sm:$0xff] }
 0x4a2   : > { %v1259_v23 = vsub.f32 %v3732_v17, %v3735_v21  ;;  %1561 = vst.msk [vmem:[#allocation5 + $0x10] sm:$0xff] %vm852_vm5, %v3735_v21  ;;  %1560 = vst.msk [vmem:[#allocation5 + $0x8] sm:$0xff] %vm852_vm5, %v1254_v22  ;;  %1281 = vperm.xlu1 %2493, %v3735_v21   ;;  %1276 = vperm.xlu0 %2494, %v1254_v22   ;;  %v1258_v34 = vsub.f32 %v1238_v18, %v1254_v22  ;;  %v1304_v17 = vld [vmem:[#allocation6 + $0x18] sm:$0xff] }
 0x4a4   : > { %v1263_v35 = vmul.f32 1.442695, %v1258_v34  ;;  %v1265_v12 = vmul.f32 1.442695, %v1259_v23 }
 0x4a7   : > { %v1252_v25 = vpop.xlane.xlu0 %1251 }
 0x4a8   : > { %v3746_v26 = vmax.f32 %v3743_v24, %v1252_v25 }
 0x4aa   : > { %v1260_v27 = vsub.f32 %v3743_v24, %v3746_v26  ;;  %1562 = vst.msk [vmem:[#allocation5 + $0x18] sm:$0xff] %vm852_vm5, %v3746_v26  ;;  %1286 = vperm.xlu1 %2493, %v3746_v26  }
 0x4ac   : > { %v1267_v13 = vmul.f32 1.442695, %v1260_v27 }
 0x4ae   : > { %v1272_v28 = vpop.permute.xlu1 %1271  ;;  %1019 = vrot.lane.b32.xlu1 %v3694_v50, %s3062_s24 }
 0x4af   : > { %v1289_v29 = vsub.f32 %v1093_v55, %v1272_v28 }
 0x4b1   : > { %v1293_v30 = vmul.f32 1.442695, %v1289_v29 }
 0x4b2   : > { %1029 = vrot.lane.b32.xlu1 %v3694_v50, %s3061_s19 }
 0x4b3   : > { %2501 = vpow2.f32 %v1293_v30 }
 0x4b4   : > { %2503 = vpow2.f32 %v1263_v35  ;;  %v1331_v35 = vld [vmem:[#allocation7 + $0x8] sm:$0xff] }
 0x4b6   : > { %1039 = vrot.lane.b32.xlu1 %v3694_v50, %s3063_s12 }
 0x4bd   : > { %v2502_v31 = vpop.eup %2501 }
 0x4be   : > { %v1358_v32 = vpack.c.bf16 %v2502_v31, %v2502_v31  ;;  %v1309_v33 = vsel %vm861_vm2, %v2502_v31, 0.0  ;;  %v3763_v36 = vpop.eup %2503  ;;  %v1608_v31 = vld [vmem:[#allocation25 + $0x4] sm:$0xf] }
 0x4bf   : > { %v1306_v15 = vmul.f32 %v3763_v36, %v1302_v14 }
 0x4c0   : > { %2261 = vmatmul.mubr.msk.bf16.vlgmr.msra.gmra.mrb[12].mxu1 %vm861_vm2, %v1358_v32  ;;  %v1613_v32 = vsel %vm1369_vm4, %v1608_v31, 0 }
 0x4c1   : > { %1310 = vadd.xlane.f32.xlu0 %v1309_v33  ;;  %2272 = vmatprep.mubr.msk.bf16.mxu1 %vm3060_vm0, %v3059_v0  ;;  %v1606_v33 = vld [vmem:[#allocation25] sm:$0xf] }
 0x4c2   : > { %v1659_v34 = vsel %vm1369_vm4, %v1606_v33, 0 }
 0x4d7   : > { %1341 = vperm.xlu0 %2494, %v3763_v36  }
 0x521   : > { %v1282_v37 = vpop.permute.xlu1 %1281  ;;  %v1277_v38 = vpop.permute.xlu0 %1276 }
 0x522   : > { %v1291_v39 = vsub.f32 %v3715_v62, %v1282_v37  ;;  %v1290_v40 = vsub.f32 %v3713_v61, %v1277_v38 }
 0x524   : > { %v1295_v41 = vmul.f32 1.442695, %v1290_v40  ;;  %v1297_v42 = vmul.f32 1.442695, %v1291_v39 }
 0x526   : > { %2505 = vpow2.f32 %v1295_v41 }
 0x527   : > { %2507 = vpow2.f32 %v1297_v42 }
 0x529   : > { %v1287_v43 = vpop.permute.xlu1 %1286 }
 0x52a   : > { %v1292_v44 = vsub.f32 %v1231_v8, %v1287_v43 }
 0x52c   : > { %v1299_v45 = vmul.f32 1.442695, %v1292_v44 }
 0x52d   : > { %v1020_v46 = vpop.permute.xlu1 %1019 }
 0x52e   : > { %2509 = vpow2.f32 %v1299_v45  ;;  %1023 = vst.msk [vmem:[#allocation4 + $0x4] sm:$0xf] %vm832_vm3, %v1020_v46 }
 0x52f   : > { %2511 = vpow2.f32 %v1261_v60 }
 0x530   : > { %v2506_v47 = vpop.eup %2505  ;;  %2513 = vpow2.f32 %v1265_v12  ;;  %v1751_v12 = vld [vmem:[#allocation25 + $0xc] sm:$0xf] }
 0x531   : > { %v1030_v48 = vpop.permute.xlu1 %1029  ;;  %v1312_v49 = vsel %vm861_vm2, %v2506_v47, 0.0  ;;  %v2508_v50 = vpop.eup %2507  ;;  %v1359_v56 = vpack.c.bf16 %v2506_v47, %v2506_v47  ;;  %2515 = vpow2.f32 %v1267_v13 }
 0x532   : > { %1033 = vst.msk [vmem:[#allocation4 + $0x8] sm:$0xf] %vm832_vm3, %v1030_v48  ;;  %1313 = vadd.xlane.f32.xlu1 %v1312_v49  ;;  %v1315_v53 = vsel %vm861_vm2, %v2508_v50, 0.0  ;;  %v1360_v61 = vpack.c.bf16 %v2508_v50, %v2508_v50 }
 0x535   : > { %v1040_v51 = vpop.permute.xlu1 %1039  ;;  %v1363_v52 = vld [vmem:[#allocation4 + $0x4] sm:$0xf] }
 0x536   : > { %1043 = vst.msk [vmem:[#allocation4 + $0xc] sm:$0xf] %vm832_vm3, %v1040_v51  ;;  %v1417_v54 = vsel %vm1369_vm4, %v1363_v52, 0  ;;  %1316 = vadd.xlane.f32.xlu1 %v1315_v53  ;;  %v1330_v53 = vld [vmem:[#allocation7] sm:$0xff] }
 0x537   : > { %2265 = vmatpush3.bf16.msra.mxu0 %v1417_v54 }
 0x538   : > { %v2510_v55 = vpop.eup %2509  ;;  %2276 = vmatprep.subr.bf16.mxu0 %v3059_v0 }
 0x539   : > { %v1318_v57 = vsel %vm861_vm2, %v2510_v55, 0.0  ;;  %v1364_v58 = vld [vmem:[#allocation4 + $0x8] sm:$0xf]  ;;  %v1361_v1 = vpack.c.bf16 %v2510_v55, %v2510_v55  ;;  %v2512_v2 = vpop.eup %2511 }
 0x53a   : > { %2267 = vmatmul.mubr.msk.bf16.vlgmr.msra.gmra.mrb[16].mxu0 %vm861_vm2, %v1359_v56  ;;  %v1463_v59 = vsel %vm1369_vm4, %v1364_v58, 0  ;;  %1319 = vadd.xlane.f32.xlu1 %v1318_v57  ;;  %v1305_v4 = vmul.f32 %v2512_v2, %v1301_v3  ;;  %v2514_v16 = vpop.eup %2513  ;;  %v1332_v57 = vld [vmem:[#allocation7 + $0x10] sm:$0xff]  ;;  %v1702_v3 = vld [vmem:[#allocation25 + $0x8] sm:$0xf] }
 0x53b   : > { %2271 = vmatpush3.bf16.msra.mxu1 %v1463_v59  ;;  %2278 = vmatprep.mubr.msk.bf16.mxu0 %vm3060_vm0, %v3059_v0  ;;  %v1307_v22 = vmul.f32 %v2514_v16, %v1303_v19  ;;  %v2516_v25 = vpop.eup %2515 }
 0x53c   : > { %2282 = vmatprep.subr.bf16.mxu1 %v3059_v0  ;;  %v1308_v23 = vmul.f32 %v2516_v25, %v1304_v17 }
 0x53d   : > { %v1365_v62 = vld [vmem:[#allocation4 + $0xc] sm:$0xf] }
 0x53e   : > { %2273 = vmatmul.mubr.msk.bf16.vlgmr.msra.gmra.mrb[16].mxu1 %vm861_vm2, %v1360_v61  ;;  %v1509_v63 = vsel %vm1369_vm4, %v1365_v62, 0  ;;  %v1333_v61 = vld [vmem:[#allocation7 + $0x18] sm:$0xff] }
 0x53f   : > { %2277 = vmatpush3.bf16.msra.mxu0 %v1509_v63  ;;  %2284 = vmatprep.mubr.msk.bf16.mxu1 %vm3060_vm0, %v3059_v0 }
 0x540   : > { %2288 = vmatprep.subr.bf16.mxu0 %v3059_v0  ;;  %2283 = vmatpush3.bf16.msra.mxu1 %v1613_v32 }
 0x541   : > { %2294 = vmatprep.subr.bf16.mxu1 %v3059_v0 }
 0x542   : > { %2279 = vmatmul.mubr.msk.bf16.vlgmr.msra.gmra.mrb[20].mxu0 %vm861_vm2, %v1361_v1 }
 0x543   : > { %2290 = vmatprep.mubr.msk.bf16.mxu0 %vm3060_vm0, %v3059_v0  ;;  %2289 = vmatpush3.bf16.msra.mxu0 %v1659_v34 }
 0x544   : > { %2300 = vmatprep.subr.bf16.mxu0 %v3059_v0 }
 0x54e   : > { %v1311_v5 = vpop.xlane.xlu0 %1310 }
 0x54f   : > { %v1321_v6 = vadd.f32 %v1311_v5, %v1305_v4 }
 0x551   : > { %1326 = vst.msk [vmem:[#allocation6] sm:$0xff] %vm852_vm5, %v1321_v6 }
 0x556   : > { %v1342_v36 = vpop.permute.xlu0 %1341 }
 0x557   : > { %v1355_v37 = vmul.f32 %v1342_v36, %v1331_v35 }
 0x558   : > { %v1570_v7 = vld [vmem:[#allocation6] sm:$0xff] }
 0x559   : > { %1576 = vperm.xlu0 %2494, %v1570_v7  }
 0x593   : > { %v3793_v8 = vpop.f32.mrb[12].mxu1 }
 0x594   : > { %v2262_v9 = vpop.f32.mrb[13].mxu1 }
 0x595   : > { %v1410_v10 = vpop.f32.mrb[14].mxu1 }
 0x596   : > { %v2263_v11 = vpop.f32.mrb[15].mxu1 }
 0x5bf   : > { %v1314_v18 = vpop.xlane.xlu1 %1313 }
 0x5c0   : > { %v1322_v20 = vadd.f32 %v1314_v18, %v1306_v15  ;;  %v1756_v15 = vsel %vm1369_vm4, %v1751_v12, 0 }
 0x5c2   : > { %1327 = vst.msk [vmem:[#allocation6 + $0x8] sm:$0xff] %vm852_vm5, %v1322_v20 }
 0x5c3   : > { %v1317_v28 = vpop.xlane.xlu1 %1316 }
 0x5c4   : > { %v1323_v21 = vadd.f32 %v1317_v28, %v1307_v22 }
 0x5c6   : > { %1328 = vst.msk [vmem:[#allocation6 + $0x10] sm:$0xff] %vm852_vm5, %v1323_v21 }
 0x5c7   : > { %v1320_v24 = vpop.xlane.xlu1 %1319 }
 0x5c8   : > { %v1324_v26 = vadd.f32 %v1320_v24, %v1308_v23 }
 0x5c9   : > { %v1571_v27 = vld [vmem:[#allocation6 + $0x8] sm:$0xff] }
 0x5ca   : > { %1329 = vst.msk [vmem:[#allocation6 + $0x18] sm:$0xff] %vm852_vm5, %v1324_v26  ;;  %1581 = vperm.xlu1 %2493, %v1571_v27  }
 0x5cd   : > { %v1572_v29 = vld [vmem:[#allocation6 + $0x10] sm:$0xff] }
 0x5ce   : > { %1336 = vperm.xlu1 %2493, %v2512_v2   ;;  %1586 = vperm.xlu0 %2494, %v1572_v29  }
 0x5d1   : > { %v1573_v30 = vld [vmem:[#allocation6 + $0x18] sm:$0xff] }
 0x5d2   : > { %1346 = vperm.xlu1 %2493, %v2514_v16   ;;  %1591 = vperm.xlu0 %2494, %v1573_v30  }
 0x5d6   : > { %1351 = vperm.xlu1 %2493, %v2516_v25  }
 0x5d8   : > { %v1577_v52 = vpop.permute.xlu0 %1576 }
 0x60d   : > { %v1453_v38 = vpop.f32.mrb[16].mxu0 }
 0x60e   : > { %v1552_v39 = vadd.f32 %v1453_v38, %v1355_v37  ;;  %v2268_v40 = vpop.f32.mrb[17].mxu0  ;;  %v2167_v38 = vld [vmem:[#allocation26] ss:$0 sm:$0xff] }
 0x60f   : > { %v1456_v41 = vpop.f32.mrb[18].mxu0 }
 0x610   : > { %1556 = vst.msk [vmem:[#allocation7 + $0x8] sm:$0xff] %vm861_vm2, %v1552_v39  ;;  %v2269_v42 = vpop.f32.mrb[19].mxu0 }
 0x611   : > { %v1499_v43 = vpop.f32.mrb[16].mxu1  ;;  %v1807_v42 = vld [vmem:[%s657_s14] sm:$0xff] }
 0x612   : > { %v2274_v44 = vpop.f32.mrb[17].mxu1 }
 0x613   : > { %v1502_v45 = vpop.f32.mrb[18].mxu1 }
 0x614   : > { %v2275_v46 = vpop.f32.mrb[19].mxu1 }
 0x615   : > { %v1545_v47 = vpop.f32.mrb[20].mxu0 }
 0x616   : > { %v2280_v48 = vpop.f32.mrb[21].mxu0 }
 0x617   : > { %v1548_v49 = vpop.f32.mrb[22].mxu0  ;;  %v1567_v63 = vld [vmem:[#allocation7 + $0x8] sm:$0xff] }
 0x618   : > { %v2281_v50 = vpop.f32.mrb[23].mxu0 }
 0x649   : > { %v1582_v51 = vpop.permute.xlu1 %1581 }
 0x64a   : > { %2517 = vrcp.f32 %v1582_v51 }
 0x64b   : > { %2519 = vrcp.f32 %v1577_v52 }
 0x64d   : > { %v1337_v54 = vpop.permute.xlu1 %1336  ;;  %v1587_v56 = vpop.permute.xlu0 %1586 }
 0x64e   : > { %v1354_v55 = vmul.f32 %v1337_v54, %v1330_v53  ;;  %2521 = vrcp.f32 %v1587_v56  ;;  %v2168_v56 = vld [vmem:[#allocation28] ss:$0 sm:$0xff] }
 0x650   : > { %v1551_v58 = vadd.f32 %v3793_v8, %v1354_v55  ;;  %v1707_v8 = vsel %vm1369_vm4, %v1702_v3, 0 }
 0x651   : > { %v1347_v59 = vpop.permute.xlu1 %1346  ;;  %v1592_v2 = vpop.permute.xlu0 %1591 }
 0x652   : > { %1555 = vst.msk [vmem:[#allocation7] sm:$0xff] %vm861_vm2, %v1551_v58  ;;  %v1356_v60 = vmul.f32 %v1347_v59, %v1332_v57  ;;  %2523 = vrcp.f32 %v1592_v2  ;;  %v2169_v58 = vld [vmem:[#allocation29] ss:$0 sm:$0xff] }
 0x654   : > { %v2518_v62 = vpop.eup %2517  ;;  %v1553_v1 = vadd.f32 %v1499_v43, %v1356_v60 }
 0x655   : > { %v1597_v4 = vmul.f32 %v2518_v62, %v1567_v63  ;;  %v1352_v5 = vpop.permute.xlu1 %1351  ;;  %v2520_v10 = vpop.eup %2519 }
 0x656   : > { %1557 = vst.msk [vmem:[#allocation7 + $0x10] sm:$0xff] %vm861_vm2, %v1553_v1  ;;  %v1357_v6 = vmul.f32 %v1352_v5, %v1333_v61 }
 0x657   : > { %v1603_v7 = vpack.c.bf16 %v1597_v4, %v1597_v4 }
 0x658   : > { %v1554_v9 = vadd.f32 %v1545_v47, %v1357_v6  ;;  %v2522_v16 = vpop.eup %2521 }
 0x659   : > { %2285 = vmatmul.mubr.msk.bf16.vlgmr.msra.gmra.mrb[20].mxu1 %vm861_vm2, %v1603_v7  ;;  %v1566_v11 = vld [vmem:[#allocation7] sm:$0xff] }
 0x65a   : > { %1558 = vst.msk [vmem:[#allocation7 + $0x18] sm:$0xff] %vm861_vm2, %v1554_v9  ;;  %2295 = vmatpush3.bf16.msra.mxu1 %v1707_v8  ;;  %v1595_v13 = vmul.f32 %v2520_v10, %v1566_v11  ;;  %2296 = vmatprep.mubr.msk.bf16.mxu1 %vm3060_vm0, %v3059_v0 }
 0x65c   : > { %v1602_v14 = vpack.c.bf16 %v1595_v13, %v1595_v13  ;;  %v2524_v22 = vpop.eup %2523 }
 0x65d   : > { %v1568_v18 = vld [vmem:[#allocation7 + $0x10] sm:$0xff] }
 0x65e   : > { %2291 = vmatmul.mubr.msk.bf16.vlgmr.msra.gmra.mrb[24].mxu0 %vm861_vm2, %v1602_v14  ;;  %v1599_v19 = vmul.f32 %v2522_v16, %v1568_v18 }
 0x65f   : > { %2301 = vmatpush3.bf16.msra.mxu0 %v1756_v15  ;;  %2302 = vmatprep.mubr.msk.bf16.mxu0 %vm3060_vm0, %v3059_v0 }
 0x660   : > { %v1604_v20 = vpack.c.bf16 %v1599_v19, %v1599_v19 }
 0x661   : > { %v1569_v25 = vld [vmem:[#allocation7 + $0x18] sm:$0xff] }
 0x662   : > { %2297 = vmatmul.mubr.msk.bf16.vlgmr.msra.gmra.mrb[24].mxu1 %vm861_vm2, %v1604_v20  ;;  %v1601_v28 = vmul.f32 %v2524_v22, %v1569_v25 }
 0x664   : > { %v1605_v17 = vpack.c.bf16 %v1601_v28, %v1601_v28 }
 0x666   : > { %2303 = vmatmul.mubr.msk.bf16.vlgmr.msra.gmra.mrb[28].mxu0 %vm861_vm2, %v1605_v17 }
 0x72c   : > { %v1649_v21 = vpop.f32.mrb[20].mxu1 }
 0x72d   : > { %v2286_v23 = vpop.f32.mrb[21].mxu1 }
 0x72e   : > { %v1652_v24 = vpop.f32.mrb[22].mxu1 }
 0x72f   : > { %v2287_v26 = vpop.f32.mrb[23].mxu1 }
 0x731   : > { %v1695_v27 = vpop.f32.mrb[24].mxu0 }
 0x732   : > { %v1696_v29 = vadd.f32 %v1695_v27, %v1649_v21  ;;  %v2292_v30 = vpop.f32.mrb[25].mxu0 }
 0x733   : > { %v1698_v31 = vpop.f32.mrb[26].mxu0 }
 0x734   : > { %v2293_v32 = vpop.f32.mrb[27].mxu0 }
 0x735   : > { %v1743_v0 = vpop.f32.mrb[24].mxu1 }
 0x736   : > { %v1749_v33 = vadd.f32 %v1743_v0, %v1696_v29  ;;  %v2298_v34 = vpop.f32.mrb[25].mxu1 }
 0x737   : > { %v1746_v35 = vpop.f32.mrb[26].mxu1 }
 0x738   : > { %v2299_v36 = vpop.f32.mrb[27].mxu1 }
 0x739   : > { %v1792_v37 = vpop.f32.mrb[28].mxu0 }
 0x73a   : > { %v1798_v39 = vadd.f32 %v1792_v37, %v1749_v33  ;;  %v2304_v40 = vpop.f32.mrb[29].mxu0 }
 0x73b   : > { %v1795_v41 = vpop.f32.mrb[30].mxu0 }
 0x73c   : > { %v1806_v43 = vadd.f32 %v2167_v38, %v1798_v39  ;;  %v2305_v44 = vpop.f32.mrb[31].mxu0 }
 0x73e   : > { %v1808_v45 = vadd.f32 %v1807_v42, %v1806_v43 }
 0x740   : > { %v1809_v46 = vsel %vm787_vm1, %v1808_v45, 0.0 }
 0x741   : > { %1810 = vadd.xlane.f32.xlu1 %v1809_v46 }
 0x7ce   : > { %v1811_v47 = vpop.xlane.xlu1 %1810 }
 0x7cf   : > { %v1813_v48 = vmul.f32 0.03125, %v1811_v47 }
 0x7d1   : > { %v1814_v49 = vsub.f32 %v1808_v45, %v1813_v48 }
 0x7d3   : > { %v1815_v50 = vmul.f32 %v1814_v49, %v1814_v49 }
 0x7d5   : > { %v1816_v51 = vsel %vm787_vm1, %v1815_v50, 0.0 }
 0x7d6   : > { %1817 = vadd.xlane.f32.xlu0 %v1816_v51 }
 0x863   : > { %v1818_v52 = vpop.xlane.xlu0 %1817 }
 0x864   : > { %v1819_v53 = vmul.f32 0.03125, %v1818_v52 }
 0x866   : > { %v1820_v54 = vadd.f32 1e-05, %v1819_v53 }
 0x868   : > { %2525 = vrsqrt.f32 %v1820_v54 }
 0x872   : > { %v2526_v55 = vpop.eup %2525 }
 0x873   : > { %v1822_v57 = vmul.f32 %v2526_v55, %v1814_v49 }
 0x875   : > { %v1830_v59 = vmul.f32 %v2168_v56, %v1822_v57 }
 0x877   : > { %v1838_v60 = vadd.f32 %v2169_v58, %v1830_v59 }
 0x879   : > { %1839 = vst.msk [vmem:[%s756_s11] sm:$0xff] %vm787_vm1, %v1838_v60 }
 0x87a   : > { %2940 = shalt.err (!%p2937_p3)
}
 0x87b   : > { %s2941_s7 = scalar_lea.hbm %s3833_s16, 128  ;;  %s2945_s19 = scalar_lea.hbm %s3993_s9, 256 }
 0x87c   : > { %p2942_p1 = scmp.ne.s32.totalorder %s3833_s16, %s2941_s7  ;;  %p2946_p0 = scmp.lt.u32.totalorder %s3833_s16, %s3993_s9 }
 0x87d   : > { %p2947_p4 = scmp.lt.u32.totalorder %s2945_s19, %s2941_s7  ;;  %p2949_p11 = scmp.lt.u32.totalorder %s2941_s7, %s3833_s16 }
 0x87e   : > { %p2943_p9 = pnand %p2942_p1, %p3994_p12 }
 0x87f   : > { %p2948_p13 = por %p2947_p4, %p2946_p0 }
 0x880   : > { %p2944_p6 = pneg %p2943_p9 }
 0x881   : > { %p2950_p10 = por %p2949_p11, %p2948_p13 }
 0x883   : > { %p2951_p7 = pnand %p2950_p10, %p2944_p6 }
 0x885   : > { %2954 = shalt.err (!%p2951_p7)
}
 0x886   : > { %2354 = dma.vmem_to_hbm [thread:$0]  (%p3994_p12), %s3835_s22, 128, %s3833_s16, %s1841_s13  }
 0x887 PF: > { %s3995_s23 = sld [smem:[#allocation47_spill]]  ;;  %s1867_s28 = sand.u32 1, %s3021_s29  }
 0x888   : > { %p3997_p2 = scmp.ge.s32.totalorder %s3041_s18, 2  ;;  %s1868_s11 = scalar_lea.sflag [#allocation10], %s1867_s28 }
 0x88d   : > { %p3996_p8 = scmp.ne.s32.totalorder %s3995_s23, 0 }
 0x88f   : > { %p2401_p5 = pnand %p3997_p2, %p3996_p8 }
 0x891   : > { %3016 = dma.done.wait (!%p2401_p5), %s1868_s11, 128  }
 0x892   : > { %3018 = vsyncadd (!%p2401_p5), %s1868_s11, 4294967168  ;;  %s41_s18 = sadd.s32 1, %s3041_s18   ;;  %s3998_s0 = sld [smem:[#allocation46_spill]] }
 0x893   : > { %p38_p3 = scmp.ge.s32.totalorder %s41_s18, 4   ;;  %s3999_s16 = sld [smem:[#allocation43_spill]] }
 0x894   : > { %s4000_s17 = sld [smem:[#allocation45_spill]]  ;;  %s4001_s29 = smov %s3025_s30 }
 0x895   : > { %s4002_s30 = smov %s3029_s15  ;;  %40 = sbr.rel (!%p38_p3) target bundleno = 29 (0x1d), region = 218 }
 0x898   : > { %s4003_s15 = smov %s3998_s0 }
 0x89c   :  { %1873 = vsyncpa [#allocation9], 1 }
 0x89d   :  { %1875 = vsyncpa [#allocation9 + $0x1], 1 }
 0x89e   :  { %1876 = vsyncpa [#allocation12], 1 }
 0x89f   :  { %1878 = vsyncpa [#allocation12 + $0x1], 1 }
 0x8a0   :  { %1879 = vsyncpa [#allocation15], 1 }
 0x8a1   :  { %1881 = vsyncpa [#allocation15 + $0x1], 1 }
 0x8a2   :  { %1882 = vsyncpa [#allocation18], 1 }
 0x8a3   :  { %1883 = vsyncpa [#allocation21], 1 }
 0x8a4   :  { %1884 = vsyncpa [#allocation24], 1 }
 0x8a5   :  { %1885 = vsyncpa [#allocation27], 1 }
 0x8a6   :  { %1886 = vsyncpa [#allocation30], 1 }
 0x8a7   :  { %1887 = vsyncpa [#allocation10], 1 }
 0x8a8   :  { %1889 = vsyncpa [#allocation10 + $0x1], 1 }

</bundles_post_ra>
